<compile_context>
chip_gen: v5e
topology: v5e:2x2
jax: 0.10.0
libtpu: 0.0.40
codegen_flags: <defaults>
</compile_context>

<pallas_src>
import functools

import jax
import jax.numpy as jnp
import numpy as np
from jax.experimental import pallas as pl
from jax.experimental.pallas import tpu as pltpu

_EPS = 1e-5
_SLOPE = 0.2
_TARGET_TILE_ROWS = 512          # per perf review: >= 256-512 rows per grid step


# ------------------------------ in-kernel helpers ------------------------------
def _shift_masks(rows, H, K):
    """Per-shift row-validity masks, computed ONCE per kernel invocation.

    Row r of the (rows, lanes) slab is image row (r % H); a shifted read of row
    r+d is valid only if it stays inside the same image ('same' padding in H).
    The expensive iota + modulo is hoisted here; each mask is one compare and
    has shape (rows, 1) so it broadcasts across lanes for free.
    """
    p = (K - 1) // 2
    h_in = jax.lax.broadcasted_iota(jnp.int32, (rows, 1), 0) % H
    return {d: (h_in + d >= 0) & (h_in + d < H)
            for d in range(-p, p + 1) if d != 0}


def _leaky(x):
    return jnp.where(x > 0, x, _SLOPE * x)


def _conv_same(x_f32, wf_ref, masks, K, compute_dtype):
    """'same' KxK conv as ONE wide-contraction MXU matmul.

    x_f32: (rows, W*Cin) f32 slab.  wf_ref: (K*W*Cin, W*Cout) fused block-banded
    weights (kh-major rows; W-direction taps and padding folded in).  The K
    H-shifted copies of the slab are built with pltpu.roll (XLU slot, nearly
    free) + precomputed boundary masks, concatenated along lanes, cast to the
    MXU compute dtype, and multiplied in one shot.  Returns f32 (rows, W*Cout).
    """
    p = (K - 1) // 2
    rows = x_f32.shape[0]
    parts = []
    for kh in range(K):
        d = kh - p                                   # output row r reads row r+d
        if d == 0:
            parts.append(x_f32)
        else:
            rolled = pltpu.roll(x_f32, shift=(-d) % rows, axis=0)
            parts.append(jnp.where(masks[d], rolled, jnp.zeros_like(rolled)))
    xcat = jnp.concatenate(parts, axis=1).astype(compute_dtype)
    return jnp.dot(xcat, wf_ref[...], preferred_element_type=jnp.float32)


def _col_stats(h):
    """(1, 2, lanes) per-column [sum, sum-of-squares] of an f32 slab."""
    s = jnp.sum(h, axis=0, keepdims=True)
    q = jnp.sum(h * h, axis=0, keepdims=True)
    return jnp.concatenate([s, q], axis=0)[None]


# ----------------------------------- kernels -----------------------------------
def _stats1_kernel(H, K, cdt):
    def kernel(x_ref, wf1_ref, stats_ref):
        masks = _shift_masks(x_ref.shape[0], H, K)
        x = x_ref[...].astype(jnp.float32)
        h1 = _conv_same(x, wf1_ref, masks, K, cdt)
        stats_ref[...] = _col_stats(h1)              # per-tile partial BN1 stats
    return kernel


def _stats2_kernel(H, K, cdt):
    def kernel(x_ref, wf1_ref, wf2_ref, sc1_ref, sh1_ref, stats_ref):
        masks = _shift_masks(x_ref.shape[0], H, K)
        x = x_ref[...].astype(jnp.float32)
        h1 = _conv_same(x, wf1_ref, masks, K, cdt)
        a1 = _leaky(h1 * sc1_ref[...] + sh1_ref[...])        # BN1 + LeakyReLU (f32)
        h2 = _conv_same(a1, wf2_ref, masks, K, cdt)
        stats_ref[...] = _col_stats(h2)              # per-tile partial BN2 stats
    return kernel


def _final_kernel(H, K, cdt, expand):
    def kernel(*refs):
        if expand:
            (x_ref, wf1_ref, wf2_ref, w3_ref,
             sc1_ref, sh1_ref, sc2_ref, sh2_ref, out_ref) = refs
        else:
            (x_ref, wf1_ref, wf2_ref,
             sc1_ref, sh1_ref, sc2_ref, sh2_ref, out_ref) = refs
        masks = _shift_masks(x_ref.shape[0], H, K)
        x = x_ref[...].astype(jnp.float32)
        h1 = _conv_same(x, wf1_ref, masks, K, cdt)
        a1 = _leaky(h1 * sc1_ref[...] + sh1_ref[...])        # BN1 + LeakyReLU
        h2 = _conv_same(a1, wf2_ref, masks, K, cdt)
        o = h2 * sc2_ref[...] + sh2_ref[...]                 # BN2
        # Identity path: re-read the input tile right before the residual add so
        # x is not held live across both convs (register pressure at big tiles).
        if expand:
            # TODO(synk): block-diagonal 1x1 wastes (W-1)/W MXU FLOPs; move to a
            # channel-contraction layout if the expand path ever shows MXU-bound.
            o = o + jnp.dot(x_ref[...], w3_ref[...],
                            preferred_element_type=jnp.float32)
        else:
            o = o + x_ref[...].astype(jnp.float32)
        out_ref[...] = _leaky(o).astype(out_ref.dtype)
    return kernel


# --------------------------- wrapper-side weight prep ---------------------------
def _banded_weights(w_hwio, W):
    """(KH, KW, Cin, Cout) HWIO conv weight -> (KH, W*Cin, W*Cout) block-banded
    matrices encoding the W-direction taps and 'same' zero padding."""
    KH, KW, Cin, Cout = w_hwio.shape
    p = (KW - 1) // 2
    wi = jnp.arange(W)[:, None]
    wo = jnp.arange(W)[None, :]
    kw = wi - wo + p                                            # (W, W)
    valid = ((kw >= 0) & (kw < KW)).astype(w_hwio.dtype)
    kw_c = jnp.clip(kw, 0, KW - 1)
    B = w_hwio[:, kw_c, :, :] * valid[None, :, :, None, None]   # (KH, Wi, Wo, Ci, Co)
    B = jnp.transpose(B, (0, 1, 3, 2, 4))                       # (KH, Wi, Ci, Wo, Co)
    return B.reshape(KH, W * Cin, W * Cout)


def _fused_banded(w_hwio, W, cdt):
    """Stack the K kh-taps along the contraction dim -> (K*W*Cin, W*Cout) so each
    conv is a single wide-contraction MXU matmul (rows kh-major, matching the
    lane order of the concatenated shifted slabs in _conv_same)."""
    wb = _banded_weights(w_hwio.astype(jnp.float32), W)
    KH, R, C = wb.shape
    return wb.reshape(KH * R, C).astype(cdt)


def _block_diag_1x1(w3, W):
    """(Cin, Cout) 1x1-conv weight -> (W*Cin, W*Cout) block-diagonal matrix."""
    B = jnp.einsum("ab,ij->aibj", jnp.eye(W, dtype=w3.dtype), w3)
    return B.reshape(W * w3.shape[0], W * w3.shape[1])


def _bn_scale_shift(partial_stats, gamma, beta, W, C, count):
    """Per-tile partial column stats -> train-mode BatchNorm scale/shift, pre-tiled
    to the (1, W*C) lane layout used inside the kernels (all in f32)."""
    s = jnp.sum(partial_stats, axis=0).reshape(2, W, C).sum(axis=1)   # (2, C)
    mean = s[0] / count
    # TODO(synk): E[x^2]-E[x]^2 is cancellation-prone if channel means get large
    # at production scale; switch to a shifted-mean two-pass variance then.
    var = s[1] / count - mean * mean                # biased var (train-mode BN)
    scale = gamma * jax.lax.rsqrt(var + _EPS)
    shift = beta - mean * scale
    tile = lambda v: jnp.tile(v.reshape(1, C).astype(jnp.float32), (1, W))
    return tile(scale), tile(shift)


# -------------------------------- tiling helpers --------------------------------
def _row_align(cdt):
    return 16 if np.dtype(cdt).itemsize == 2 else 8


def _pick_block_images(N, H, cdt, target_rows=_TARGET_TILE_ROWS):
    """Largest whole-image row tile <= target_rows that divides N and keeps the
    sublane dimension aligned for the compute dtype (grid of 1 always legal)."""
    align = _row_align(cdt)
    best = N
    for m in range(1, N + 1):
        rows = m * H
        if N % m == 0 and rows <= target_rows and rows % align == 0:
            best = m
    return best


def _vmem_limit_bytes(rows, W, Cin, Chid, Cout, K, cdt):
    """Scoped-VMEM budget derived from the actual tile sizes (double-buffered I/O
    + resident weights + f32 intermediates), capped to what the local chip can
    offer (v7x only has 64 MiB of VMEM)."""
    cb = np.dtype(cdt).itemsize
    l_in, l_hid, l_out = W * Cin, W * Chid, W * Cout
    io = 2 * rows * (l_in * cb + l_out * 4)                      # 2x in/out buffers
    wts = cb * (K * l_in * l_hid + K * l_hid * l_out + l_in * l_out)
    inter = 4 * rows * (K * l_in + K * l_hid + 2 * l_hid + 2 * l_out)
    need = int(1.5 * (io + wts + inter)) + (4 << 20)
    try:
        cap = int(0.75 * pltpu.get_tpu_info().vmem_capacity_bytes)
    except Exception:
        cap = 64 << 20
    return max(min(need, cap), 16 << 20)


# -------------------------------- public wrappers --------------------------------
@functools.partial(jax.jit,
                   static_argnames=("H", "W", "block_images", "compute_dtype"))
def residual_block_forward_slab(x_slab, w1, w2, w3, g1, b1, g2, b2, *,
                                H, W, block_images=None,
                                compute_dtype=jnp.bfloat16):
    """ResidualBlock forward on a lane-dense (N*H, W*Cin) activation slab.

    Keeps the slab layout in and out so chained blocks avoid NCHW<->slab
    relayouts (pure HBM traffic).  w1: (K,K,Cin,Chid), w2: (K,K,Chid,Cout) HWIO,
    w3: (Cin,Cout) or None.  Returns an (N*H, W*Cout) slab in compute_dtype.
    """
    cdt = np.dtype(compute_dtype)
    K, _, Cin, Chid = w1.shape
    Cout = w2.shape[-1]
    rows_total, lanes_in = x_slab.shape
    assert lanes_in == W * Cin and rows_total % H == 0
    N = rows_total // H
    expand = w3 is not None

    # Row-tile selection: whole images per tile so the H 'same' padding never
    # crosses a tile boundary (no halo DMA needed).
    if block_images is None:
        bi = _pick_block_images(N, H, cdt)
    else:
        bi = block_images
        if N % bi != 0 or (bi != N and (bi * H) % _row_align(cdt) != 0):
            bi = N                                   # fall back to a single tile
    T = N // bi
    rows = bi * H

    L_in, L_hid, L_out = W * Cin, W * Chid, W * Cout
    count = float(N * H * W)

    x_slab = x_slab.astype(cdt)
    wf1 = _fused_banded(w1, W, cdt)                  # (K*W*Cin,  W*Chid)
    wf2 = _fused_banded(w2, W, cdt)                  # (K*W*Chid, W*Cout)
    w3b = (_block_diag_1x1(w3.astype(jnp.float32), W).astype(cdt)
           if expand else None)

    params = pltpu.CompilerParams(
        dimension_semantics=("parallel",),           # row tiles are independent
        vmem_limit_bytes=_vmem_limit_bytes(rows, W, Cin, Chid, Cout, K, cdt),
    )
    # TODO(synk): on v6e (128 MiB VMEM) add pipeline_mode=pl.Buffered(3) here for
    # deeper input buffering once tiles are production-sized.
    x_spec = pl.BlockSpec((rows, L_in), lambda i: (i, 0))

    def full_spec(shape):
        return pl.BlockSpec(shape, lambda i: (0,) * len(shape))

    # ---- pass 1: conv1 per tile -> per-tile partial BN1 stats -----------------
    stats1 = pl.pallas_call(
        _stats1_kernel(H, K, cdt),
        grid=(T,),
        in_specs=[x_spec, full_spec((K * L_in, L_hid))],
        out_specs=pl.BlockSpec((1, 2, L_hid), lambda i: (i, 0, 0)),
        out_shape=jax.ShapeDtypeStruct((T, 2, L_hid), jnp.float32),
        compiler_params=params,
    )(x_slab, wf1)
    sc1, sh1 = _bn_scale_shift(stats1, g1.astype(jnp.float32),
                               b1.astype(jnp.float32), W, Chid, count)

    # ---- pass 2: conv1 -> BN1 -> LReLU -> conv2 -> per-tile partial BN2 stats --
    # (conv1 is recomputed instead of round-tripping h1 through HBM: the block is
    #  HBM-bandwidth bound at production VAE sizes, so recompute is cheaper.)
    stats2 = pl.pallas_call(
        _stats2_kernel(H, K, cdt),
        grid=(T,),
        in_specs=[x_spec, full_spec((K * L_in, L_hid)),
                  full_spec((K * L_hid, L_out)),
                  full_spec((1, L_hid)), full_spec((1, L_hid))],
        out_specs=pl.BlockSpec((1, 2, L_out), lambda i: (i, 0, 0)),
        out_shape=jax.ShapeDtypeStruct((T, 2, L_out), jnp.float32),
        compiler_params=params,
    )(x_slab, wf1, wf2, sc1, sh1)
    sc2, sh2 = _bn_scale_shift(stats2, g2.astype(jnp.float32),
                               b2.astype(jnp.float32), W, Cout, count)

    # ---- pass 3: full block -> normalized, residual-added, activated output ----
    in_specs = [x_spec, full_spec((K * L_in, L_hid)), full_spec((K * L_hid, L_out))]
    args = [x_slab, wf1, wf2]
    if expand:
        in_specs.append(full_spec((L_in, L_out)))
        args.append(w3b)
    in_specs += [full_spec((1, L_hid)), full_spec((1, L_hid)),
                 full_spec((1, L_out)), full_spec((1, L_out))]
    args += [sc1, sh1, sc2, sh2]

    out_slab = pl.pallas_call(
        _final_kernel(H, K, cdt, expand),
        grid=(T,),
        in_specs=in_specs,
        out_specs=pl.BlockSpec((rows, L_out), lambda i: (i, 0)),
        out_shape=jax.ShapeDtypeStruct((N * H, L_out), cdt),
        compiler_params=params,
    )(*args)
    return out_slab


@functools.partial(jax.jit, static_argnames=("block_images", "compute_dtype"))
def residual_block_forward(x_nchw, w1, w2, w3, g1, b1, g2, b2, *,
                           block_images=None, compute_dtype=jnp.bfloat16):
    """ResidualBlock forward, NCHW in / NCHW out (layout-conversion wrapper).
    Chained blocks should prefer residual_block_forward_slab to keep the
    lane-dense slab layout between blocks."""
    N, Cin, H, W = x_nchw.shape
    Cout = w2.shape[-1]
    x_slab = jnp.transpose(x_nchw, (0, 2, 3, 1)).reshape(N * H, W * Cin)
    out_slab = residual_block_forward_slab(
        x_slab, w1, w2, w3, g1, b1, g2, b2, H=H, W=W,
        block_images=block_images, compute_dtype=compute_dtype)
    out = out_slab.reshape(N, H, W, Cout).astype(x_nchw.dtype)
    return jnp.transpose(out, (0, 3, 1, 2))


# ------------------------------ pure-JAX reference ------------------------------
def reference_forward(x_nchw, w1, w2, w3, g1, b1, g2, b2):
    x = jnp.transpose(x_nchw, (0, 2, 3, 1)).astype(jnp.float32)
    dn = ("NHWC", "HWIO", "NHWC")

    def conv(a, w):
        return jax.lax.conv_general_dilated(
            a, w, (1, 1), "SAME", dimension_numbers=dn,
            precision=jax.lax.Precision.HIGHEST)

    def bn(h, g, b):
        mean = jnp.mean(h, axis=(0, 1, 2), keepdims=True)
        var = jnp.mean((h - mean) ** 2, axis=(0, 1, 2), keepdims=True)
        return (h - mean) * jax.lax.rsqrt(var + _EPS) * g + b

    def lrelu(h):
        return jnp.where(h > 0, h, _SLOPE * h)

    identity = conv(x, w3[None, None, :, :]) if w3 is not None else x
    h = lrelu(bn(conv(x, w1), g1, b1))
    h = bn(conv(h, w2), g2, b2)
    out = lrelu(h + identity)
    return jnp.transpose(out, (0, 3, 1, 2))


# ------------------------------------ main ---------------------------------------
if __name__ == "__main__":
    N, Cin, Chid, Cout, H, W, K = 2, 4, 8, 8, 16, 16, 3

    key = jax.random.PRNGKey(0)
    kx, k1, k2, k3, kx2, k4, k5 = jax.random.split(key, 7)

    # ---- Case 1: expand_channels=True, bf16 MXU inputs, 2 row tiles ----
    x = jax.random.normal(kx, (N, Cin, H, W), jnp.float32)
    w1 = 0.1 * jax.random.normal(k1, (K, K, Cin, Chid), jnp.float32)
    w2 = 0.1 * jax.random.normal(k2, (K, K, Chid, Cout), jnp.float32)
    w3 = 0.1 * jax.random.normal(k3, (Cin, Cout), jnp.float32)
    g1 = jnp.ones((Chid,), jnp.float32)
    b1 = jnp.zeros((Chid,), jnp.float32)
    g2 = jnp.ones((Cout,), jnp.float32)
    b2 = jnp.zeros((Cout,), jnp.float32)

    ref = jax.block_until_ready(reference_forward(x, w1, w2, w3, g1, b1, g2, b2))
    out = jax.block_until_ready(residual_block_forward(
        x, w1, w2, w3, g1, b1, g2, b2, block_images=1,
        compute_dtype=jnp.bfloat16))
    assert out.shape == (N, Cout, H, W)
    err = float(jnp.max(jnp.abs(out - ref)))
    assert jnp.allclose(out, ref, atol=2e-2, rtol=2e-2), \
        f"bf16 expand case max abs err {err}"

    # ---- Case 2: same inputs, f32 MXU path (tight tolerance), 2 row tiles ----
    out32 = jax.block_until_ready(residual_block_forward(
        x, w1, w2, w3, g1, b1, g2, b2, block_images=1,
        compute_dtype=jnp.float32))
    err32 = float(jnp.max(jnp.abs(out32 - ref)))
    assert jnp.allclose(out32, ref, atol=2e-3, rtol=2e-3), \
        f"f32 expand case max abs err {err32}"

    # ---- Case 3: expand_channels=False (identity = input), default tiling ----
    C = Chid
    x2 = jax.random.normal(kx2, (N, C, H, W), jnp.float32)
    w1b = 0.1 * jax.random.normal(k4, (K, K, C, C), jnp.float32)
    w2b = 0.1 * jax.random.normal(k5, (K, K, C, C), jnp.float32)
    ref2 = jax.block_until_ready(reference_forward(x2, w1b, w2b, None, g1, b1, g2, b2))
    out2 = jax.block_until_ready(residual_block_forward(
        x2, w1b, w2b, None, g1, b1, g2, b2, compute_dtype=jnp.bfloat16))
    err2 = float(jnp.max(jnp.abs(out2 - ref2)))
    assert jnp.allclose(out2, ref2, atol=2e-2, rtol=2e-2), \
        f"bf16 identity case max abs err {err2}"

    print("KERNEL_OK")
</pallas_src>

<mosaic_0001>
module attributes {stable_mosaic.version = 11 : i64} {
  func.func @kernel(%arg0: i32, %arg1: memref<16x64xbf16, #tpu.memory_space<vmem>>, %arg2: memref<192x128xbf16, #tpu.memory_space<vmem>>, %arg3: memref<1x2x128xf32, #tpu.memory_space<vmem>>) attributes {dimension_semantics = [#tpu.dimension_semantics<parallel>], iteration_bounds = array<i64: 2>, scalar_prefetch = 0 : i64, scratch_operands = 0 : i64, tpu.core_type = #tpu.core_type<tc>, window_params = [{transform_indices = @transform_0, window_bounds = array<i64: 16, 64>}, {pipeline_mode = #tpu.pipeline_mode<synchronous>, transform_indices = @transform_1, window_bounds = array<i64: 192, 128>}, {transform_indices = @transform_2, window_bounds = array<i64: 1, 2, 128>}]} {
    %0 = tpu.iota {dimensions = array<i32: 0>} : vector<16x1xi32>
    %c16_i32 = arith.constant 16 : i32
    %c0_i32 = arith.constant 0 : i32
    %1 = arith.cmpi eq, %c16_i32, %c0_i32 : i32
    %c1_i32 = arith.constant 1 : i32
    %2 = arith.select %1, %c1_i32, %c16_i32 : i32
    %3 = vector.broadcast %2 : i32 to vector<16x1xi32>
    %4 = arith.remsi %0, %3 : vector<16x1xi32>
    %c0_i32_0 = arith.constant 0 : i32
    %5 = vector.broadcast %c0_i32_0 : i32 to vector<16x1xi32>
    %6 = arith.cmpi ne, %4, %5 : vector<16x1xi32>
    %c0_i32_1 = arith.constant 0 : i32
    %7 = vector.broadcast %c0_i32_1 : i32 to vector<16x1xi32>
    %8 = arith.cmpi slt, %4, %7 : vector<16x1xi32>
    %c0_i32_2 = arith.constant 0 : i32
    %9 = arith.cmpi slt, %2, %c0_i32_2 : i32
    %10 = vector.broadcast %9 : i1 to vector<16x1xi1>
    %11 = vector.broadcast %10 : vector<16x1xi1> to vector<16x1xi1>
    %12 = arith.xori %8, %11 : vector<16x1xi1>
    %13 = arith.andi %12, %6 : vector<16x1xi1>
    %14 = vector.broadcast %2 : i32 to vector<16x1xi32>
    %15 = arith.addi %4, %14 : vector<16x1xi32>
    %16 = arith.select %13, %15, %4 : vector<16x1xi1>, vector<16x1xi32>
    %c-1_i32 = arith.constant -1 : i32
    %17 = vector.broadcast %c-1_i32 : i32 to vector<16x1xi32>
    %18 = arith.addi %16, %17 : vector<16x1xi32>
    %c0_i32_3 = arith.constant 0 : i32
    %19 = vector.broadcast %c0_i32_3 : i32 to vector<16x1xi32>
    %20 = arith.cmpi sge, %18, %19 : vector<16x1xi32>
    %c-1_i32_4 = arith.constant -1 : i32
    %21 = vector.broadcast %c-1_i32_4 : i32 to vector<16x1xi32>
    %22 = arith.addi %16, %21 : vector<16x1xi32>
    %c16_i32_5 = arith.constant 16 : i32
    %23 = vector.broadcast %c16_i32_5 : i32 to vector<16x1xi32>
    %24 = arith.cmpi slt, %22, %23 : vector<16x1xi32>
    %25 = arith.andi %20, %24 : vector<16x1xi1>
    %c1_i32_6 = arith.constant 1 : i32
    %26 = vector.broadcast %c1_i32_6 : i32 to vector<16x1xi32>
    %27 = arith.addi %16, %26 : vector<16x1xi32>
    %c0_i32_7 = arith.constant 0 : i32
    %28 = vector.broadcast %c0_i32_7 : i32 to vector<16x1xi32>
    %29 = arith.cmpi sge, %27, %28 : vector<16x1xi32>
    %c1_i32_8 = arith.constant 1 : i32
    %30 = vector.broadcast %c1_i32_8 : i32 to vector<16x1xi32>
    %31 = arith.addi %16, %30 : vector<16x1xi32>
    %c16_i32_9 = arith.constant 16 : i32
    %32 = vector.broadcast %c16_i32_9 : i32 to vector<16x1xi32>
    %33 = arith.cmpi slt, %31, %32 : vector<16x1xi32>
    %34 = arith.andi %29, %33 : vector<16x1xi1>
    %c0 = arith.constant 0 : index
    %c0_10 = arith.constant 0 : index
    %35 = vector.load %arg1[%c0, %c0_10] : memref<16x64xbf16, #tpu.memory_space<vmem>>, vector<16x64xbf16>
    %36 = arith.extf %35 : vector<16x64xbf16> to vector<16x64xf32>
    %c1_i32_11 = arith.constant 1 : i32
    %37 = tpu.dynamic_rotate %36 by %c1_i32_11 dim 0 : vector<16x64xf32>, i32 -> vector<16x64xf32>
    %cst = arith.constant 0.000000e+00 : f32
    %38 = vector.broadcast %cst : f32 to vector<16x64xf32>
    %39 = vector.shape_cast %25 : vector<16x1xi1> to vector<16x1xi1>
    %40 = vector.broadcast %39 : vector<16x1xi1> to vector<16x64xi1>
    %41 = arith.select %40, %37, %38 : vector<16x64xi1>, vector<16x64xf32>
    %c15_i32 = arith.constant 15 : i32
    %42 = tpu.dynamic_rotate %36 by %c15_i32 dim 0 : vector<16x64xf32>, i32 -> vector<16x64xf32>
    %cst_12 = arith.constant 0.000000e+00 : f32
    %43 = vector.broadcast %cst_12 : f32 to vector<16x64xf32>
    %44 = vector.shape_cast %34 : vector<16x1xi1> to vector<16x1xi1>
    %45 = vector.broadcast %44 : vector<16x1xi1> to vector<16x64xi1>
    %46 = arith.select %45, %42, %43 : vector<16x64xi1>, vector<16x64xf32>
    %47 = tpu.concatenate %41, %36, %46 in 1 : vector<16x64xf32>, vector<16x64xf32>, vector<16x64xf32> -> vector<16x192xf32>
    %48 = arith.truncf %47 : vector<16x192xf32> to vector<16x192xbf16>
    %c0_13 = arith.constant 0 : index
    %c0_14 = arith.constant 0 : index
    %49 = vector.load %arg2[%c0_13, %c0_14] : memref<192x128xbf16, #tpu.memory_space<vmem>>, vector<192x128xbf16>
    %cst_15 = arith.constant dense<0.000000e+00> : vector<16x128xf32>
    %50 = tpu.matmul %48, %49, %cst_15 {dimension_numbers = #tpu.dot_dimension_numbers<[1], [0], [0], [1], [0, 0, 1, 1], [], []>} : vector<16x192xbf16>, vector<192x128xbf16>, vector<16x128xf32> -> vector<16x128xf32>
    %cst_16 = arith.constant dense<0.000000e+00> : vector<128xf32>
    %51 = vector.multi_reduction <add>, %50, %cst_16 [0] : vector<16x128xf32> to vector<128xf32>
    %52 = vector.shape_cast %51 : vector<128xf32> to vector<1x128xf32>
    %53 = arith.mulf %50, %50 : vector<16x128xf32>
    %cst_17 = arith.constant dense<0.000000e+00> : vector<128xf32>
    %54 = vector.multi_reduction <add>, %53, %cst_17 [0] : vector<16x128xf32> to vector<128xf32>
    %55 = vector.shape_cast %54 : vector<128xf32> to vector<1x128xf32>
    %56 = tpu.concatenate %52, %55 in 0 : vector<1x128xf32>, vector<1x128xf32> -> vector<2x128xf32>
    %57 = vector.shape_cast %56 : vector<2x128xf32> to vector<1x2x128xf32>
    %c0_18 = arith.constant 0 : index
    %c0_19 = arith.constant 0 : index
    %c0_20 = arith.constant 0 : index
    %58 = vector.load %arg3[%c0_18, %c0_19, %c0_20] : memref<1x2x128xf32, #tpu.memory_space<vmem>>, vector<1x2x128xf32>
    tpu.vector_store %arg3[%c0_18, %c0_19, %c0_20], %57 {strides = array<i32>} : memref<1x2x128xf32, #tpu.memory_space<vmem>>, vector<1x2x128xf32>,
    return
  }
  func.func @transform_0(%arg0: i32) -> (i32, i32) {
    %c0_i32 = arith.constant 0 : i32
    %c0_i32_0 = arith.constant 0 : i32
    return %arg0, %c0_i32 : i32, i32
  }
  func.func @transform_1(%arg0: i32) -> (i32, i32) {
    %c0_i32 = arith.constant 0 : i32
    %c0_i32_0 = arith.constant 0 : i32
    %c0_i32_1 = arith.constant 0 : i32
    return %c0_i32, %c0_i32_0 : i32, i32
  }
  func.func @transform_2(%arg0: i32) -> (i32, i32, i32) {
    %c0_i32 = arith.constant 0 : i32
    %c0_i32_0 = arith.constant 0 : i32
    %c0_i32_1 = arith.constant 0 : i32
    return %arg0, %c0_i32, %c0_i32_0 : i32, i32, i32
  }
}

module attributes {stable_mosaic.version = 11 : i64} {
  func.func @kernel(%arg0: i32, %arg1: memref<16x64xbf16, #tpu.memory_space<vmem>>, %arg2: memref<192x128xbf16, #tpu.memory_space<vmem>>, %arg3: memref<384x128xbf16, #tpu.memory_space<vmem>>, %arg4: memref<1x128xf32, #tpu.memory_space<vmem>>, %arg5: memref<1x128xf32, #tpu.memory_space<vmem>>, %arg6: memref<1x2x128xf32, #tpu.memory_space<vmem>>) attributes {dimension_semantics = [#tpu.dimension_semantics<parallel>], iteration_bounds = array<i64: 2>, scalar_prefetch = 0 : i64, scratch_operands = 0 : i64, tpu.core_type = #tpu.core_type<tc>, window_params = [{transform_indices = @transform_0, window_bounds = array<i64: 16, 64>}, {pipeline_mode = #tpu.pipeline_mode<synchronous>, transform_indices = @transform_1, window_bounds = array<i64: 192, 128>}, {pipeline_mode = #tpu.pipeline_mode<synchronous>, transform_indices = @transform_2, window_bounds = array<i64: 384, 128>}, {pipeline_mode = #tpu.pipeline_mode<synchronous>, transform_indices = @transform_3, window_bounds = array<i64: 1, 128>}, {pipeline_mode = #tpu.pipeline_mode<synchronous>, transform_indices = @transform_4, window_bounds = array<i64: 1, 128>}, {transform_indices = @transform_5, window_bounds = array<i64: 1, 2, 128>}]} {
    %0 = tpu.iota {dimensions = array<i32: 0>} : vector<16x1xi32>
    %c16_i32 = arith.constant 16 : i32
    %c0_i32 = arith.constant 0 : i32
    %1 = arith.cmpi eq, %c16_i32, %c0_i32 : i32
    %c1_i32 = arith.constant 1 : i32
    %2 = arith.select %1, %c1_i32, %c16_i32 : i32
    %3 = vector.broadcast %2 : i32 to vector<16x1xi32>
    %4 = arith.remsi %0, %3 : vector<16x1xi32>
    %c0_i32_0 = arith.constant 0 : i32
    %5 = vector.broadcast %c0_i32_0 : i32 to vector<16x1xi32>
    %6 = arith.cmpi ne, %4, %5 : vector<16x1xi32>
    %c0_i32_1 = arith.constant 0 : i32
    %7 = vector.broadcast %c0_i32_1 : i32 to vector<16x1xi32>
    %8 = arith.cmpi slt, %4, %7 : vector<16x1xi32>
    %c0_i32_2 = arith.constant 0 : i32
    %9 = arith.cmpi slt, %2, %c0_i32_2 : i32
    %10 = vector.broadcast %9 : i1 to vector<16x1xi1>
    %11 = vector.broadcast %10 : vector<16x1xi1> to vector<16x1xi1>
    %12 = arith.xori %8, %11 : vector<16x1xi1>
    %13 = arith.andi %12, %6 : vector<16x1xi1>
    %14 = vector.broadcast %2 : i32 to vector<16x1xi32>
    %15 = arith.addi %4, %14 : vector<16x1xi32>
    %16 = arith.select %13, %15, %4 : vector<16x1xi1>, vector<16x1xi32>
    %c-1_i32 = arith.constant -1 : i32
    %17 = vector.broadcast %c-1_i32 : i32 to vector<16x1xi32>
    %18 = arith.addi %16, %17 : vector<16x1xi32>
    %c0_i32_3 = arith.constant 0 : i32
    %19 = vector.broadcast %c0_i32_3 : i32 to vector<16x1xi32>
    %20 = arith.cmpi sge, %18, %19 : vector<16x1xi32>
    %c-1_i32_4 = arith.constant -1 : i32
    %21 = vector.broadcast %c-1_i32_4 : i32 to vector<16x1xi32>
    %22 = arith.addi %16, %21 : vector<16x1xi32>
    %c16_i32_5 = arith.constant 16 : i32
    %23 = vector.broadcast %c16_i32_5 : i32 to vector<16x1xi32>
    %24 = arith.cmpi slt, %22, %23 : vector<16x1xi32>
    %25 = arith.andi %20, %24 : vector<16x1xi1>
    %c1_i32_6 = arith.constant 1 : i32
    %26 = vector.broadcast %c1_i32_6 : i32 to vector<16x1xi32>
    %27 = arith.addi %16, %26 : vector<16x1xi32>
    %c0_i32_7 = arith.constant 0 : i32
    %28 = vector.broadcast %c0_i32_7 : i32 to vector<16x1xi32>
    %29 = arith.cmpi sge, %27, %28 : vector<16x1xi32>
    %c1_i32_8 = arith.constant 1 : i32
    %30 = vector.broadcast %c1_i32_8 : i32 to vector<16x1xi32>
    %31 = arith.addi %16, %30 : vector<16x1xi32>
    %c16_i32_9 = arith.constant 16 : i32
    %32 = vector.broadcast %c16_i32_9 : i32 to vector<16x1xi32>
    %33 = arith.cmpi slt, %31, %32 : vector<16x1xi32>
    %34 = arith.andi %29, %33 : vector<16x1xi1>
    %c0 = arith.constant 0 : index
    %c0_10 = arith.constant 0 : index
    %35 = vector.load %arg1[%c0, %c0_10] : memref<16x64xbf16, #tpu.memory_space<vmem>>, vector<16x64xbf16>
    %36 = arith.extf %35 : vector<16x64xbf16> to vector<16x64xf32>
    %c1_i32_11 = arith.constant 1 : i32
    %37 = tpu.dynamic_rotate %36 by %c1_i32_11 dim 0 : vector<16x64xf32>, i32 -> vector<16x64xf32>
    %cst = arith.constant 0.000000e+00 : f32
    %38 = vector.broadcast %cst : f32 to vector<16x64xf32>
    %39 = vector.shape_cast %25 : vector<16x1xi1> to vector<16x1xi1>
    %40 = vector.broadcast %39 : vector<16x1xi1> to vector<16x64xi1>
    %41 = arith.select %40, %37, %38 : vector<16x64xi1>, vector<16x64xf32>
    %c15_i32 = arith.constant 15 : i32
    %42 = tpu.dynamic_rotate %36 by %c15_i32 dim 0 : vector<16x64xf32>, i32 -> vector<16x64xf32>
    %cst_12 = arith.constant 0.000000e+00 : f32
    %43 = vector.broadcast %cst_12 : f32 to vector<16x64xf32>
    %44 = vector.shape_cast %34 : vector<16x1xi1> to vector<16x1xi1>
    %45 = vector.broadcast %44 : vector<16x1xi1> to vector<16x64xi1>
    %46 = arith.select %45, %42, %43 : vector<16x64xi1>, vector<16x64xf32>
    %47 = tpu.concatenate %41, %36, %46 in 1 : vector<16x64xf32>, vector<16x64xf32>, vector<16x64xf32> -> vector<16x192xf32>
    %48 = arith.truncf %47 : vector<16x192xf32> to vector<16x192xbf16>
    %c0_13 = arith.constant 0 : index
    %c0_14 = arith.constant 0 : index
    %49 = vector.load %arg2[%c0_13, %c0_14] : memref<192x128xbf16, #tpu.memory_space<vmem>>, vector<192x128xbf16>
    %cst_15 = arith.constant dense<0.000000e+00> : vector<16x128xf32>
    %50 = tpu.matmul %48, %49, %cst_15 {dimension_numbers = #tpu.dot_dimension_numbers<[1], [0], [0], [1], [0, 0, 1, 1], [], []>} : vector<16x192xbf16>, vector<192x128xbf16>, vector<16x128xf32> -> vector<16x128xf32>
    %c0_16 = arith.constant 0 : index
    %c0_17 = arith.constant 0 : index
    %51 = vector.load %arg4[%c0_16, %c0_17] : memref<1x128xf32, #tpu.memory_space<vmem>>, vector<1x128xf32>
    %52 = vector.broadcast %51 : vector<1x128xf32> to vector<16x128xf32>
    %53 = arith.mulf %50, %52 : vector<16x128xf32>
    %c0_18 = arith.constant 0 : index
    %c0_19 = arith.constant 0 : index
    %54 = vector.load %arg5[%c0_18, %c0_19] : memref<1x128xf32, #tpu.memory_space<vmem>>, vector<1x128xf32>
    %55 = vector.broadcast %54 : vector<1x128xf32> to vector<16x128xf32>
    %56 = arith.addf %53, %55 : vector<16x128xf32>
    %cst_20 = arith.constant 0.000000e+00 : f32
    %57 = vector.broadcast %cst_20 : f32 to vector<16x128xf32>
    %58 = arith.cmpf ogt, %56, %57 : vector<16x128xf32>
    %cst_21 = arith.constant 2.000000e-01 : f32
    %59 = vector.broadcast %cst_21 : f32 to vector<16x128xf32>
    %60 = arith.mulf %59, %56 : vector<16x128xf32>
    %61 = arith.select %58, %56, %60 : vector<16x128xi1>, vector<16x128xf32>
    %c1_i32_22 = arith.constant 1 : i32
    %62 = tpu.dynamic_rotate %61 by %c1_i32_22 dim 0 : vector<16x128xf32>, i32 -> vector<16x128xf32>
    %cst_23 = arith.constant 0.000000e+00 : f32
    %63 = vector.broadcast %cst_23 : f32 to vector<16x128xf32>
    %64 = vector.shape_cast %25 : vector<16x1xi1> to vector<16x1xi1>
    %65 = vector.broadcast %64 : vector<16x1xi1> to vector<16x128xi1>
    %66 = arith.select %65, %62, %63 : vector<16x128xi1>, vector<16x128xf32>
    %c15_i32_24 = arith.constant 15 : i32
    %67 = tpu.dynamic_rotate %61 by %c15_i32_24 dim 0 : vector<16x128xf32>, i32 -> vector<16x128xf32>
    %cst_25 = arith.constant 0.000000e+00 : f32
    %68 = vector.broadcast %cst_25 : f32 to vector<16x128xf32>
    %69 = vector.shape_cast %34 : vector<16x1xi1> to vector<16x1xi1>
    %70 = vector.broadcast %69 : vector<16x1xi1> to vector<16x128xi1>
    %71 = arith.select %70, %67, %68 : vector<16x128xi1>, vector<16x128xf32>
    %72 = tpu.concatenate %66, %61, %71 in 1 : vector<16x128xf32>, vector<16x128xf32>, vector<16x128xf32> -> vector<16x384xf32>
    %73 = arith.truncf %72 : vector<16x384xf32> to vector<16x384xbf16>
    %c0_26 = arith.constant 0 : index
    %c0_27 = arith.constant 0 : index
    %74 = vector.load %arg3[%c0_26, %c0_27] : memref<384x128xbf16, #tpu.memory_space<vmem>>, vector<384x128xbf16>
    %cst_28 = arith.constant dense<0.000000e+00> : vector<16x128xf32>
    %75 = tpu.matmul %73, %74, %cst_28 {dimension_numbers = #tpu.dot_dimension_numbers<[1], [0], [0], [1], [0, 0, 1, 1], [], []>} : vector<16x384xbf16>, vector<384x128xbf16>, vector<16x128xf32> -> vector<16x128xf32>
    %cst_29 = arith.constant dense<0.000000e+00> : vector<128xf32>
    %76 = vector.multi_reduction <add>, %75, %cst_29 [0] : vector<16x128xf32> to vector<128xf32>
    %77 = vector.shape_cast %76 : vector<128xf32> to vector<1x128xf32>
    %78 = arith.mulf %75, %75 : vector<16x128xf32>
    %cst_30 = arith.constant dense<0.000000e+00> : vector<128xf32>
    %79 = vector.multi_reduction <add>, %78, %cst_30 [0] : vector<16x128xf32> to vector<128xf32>
    %80 = vector.shape_cast %79 : vector<128xf32> to vector<1x128xf32>
    %81 = tpu.concatenate %77, %80 in 0 : vector<1x128xf32>, vector<1x128xf32> -> vector<2x128xf32>
    %82 = vector.shape_cast %81 : vector<2x128xf32> to vector<1x2x128xf32>
    %c0_31 = arith.constant 0 : index
    %c0_32 = arith.constant 0 : index
    %c0_33 = arith.constant 0 : index
    %83 = vector.load %arg6[%c0_31, %c0_32, %c0_33] : memref<1x2x128xf32, #tpu.memory_space<vmem>>, vector<1x2x128xf32>
    tpu.vector_store %arg6[%c0_31, %c0_32, %c0_33], %82 {strides = array<i32>} : memref<1x2x128xf32, #tpu.memory_space<vmem>>, vector<1x2x128xf32>,
    return
  }
  func.func @transform_0(%arg0: i32) -> (i32, i32) {
    %c0_i32 = arith.constant 0 : i32
    %c0_i32_0 = arith.constant 0 : i32
    return %arg0, %c0_i32 : i32, i32
  }
  func.func @transform_1(%arg0: i32) -> (i32, i32) {
    %c0_i32 = arith.constant 0 : i32
    %c0_i32_0 = arith.constant 0 : i32
    %c0_i32_1 = arith.constant 0 : i32
    return %c0_i32, %c0_i32_0 : i32, i32
  }
  func.func @transform_2(%arg0: i32) -> (i32, i32) {
    %c0_i32 = arith.constant 0 : i32
    %c0_i32_0 = arith.constant 0 : i32
    %c0_i32_1 = arith.constant 0 : i32
    return %c0_i32, %c0_i32_0 : i32, i32
  }
  func.func @transform_3(%arg0: i32) -> (i32, i32) {
    %c0_i32 = arith.constant 0 : i32
    %c0_i32_0 = arith.constant 0 : i32
    %c0_i32_1 = arith.constant 0 : i32
    return %c0_i32, %c0_i32_0 : i32, i32
  }
  func.func @transform_4(%arg0: i32) -> (i32, i32) {
    %c0_i32 = arith.constant 0 : i32
    %c0_i32_0 = arith.constant 0 : i32
    %c0_i32_1 = arith.constant 0 : i32
    return %c0_i32, %c0_i32_0 : i32, i32
  }
  func.func @transform_5(%arg0: i32) -> (i32, i32, i32) {
    %c0_i32 = arith.constant 0 : i32
    %c0_i32_0 = arith.constant 0 : i32
    %c0_i32_1 = arith.constant 0 : i32
    return %arg0, %c0_i32, %c0_i32_0 : i32, i32, i32
  }
}

module attributes {stable_mosaic.version = 11 : i64} {
  func.func @kernel(%arg0: i32, %arg1: memref<16x64xbf16, #tpu.memory_space<vmem>>, %arg2: memref<192x128xbf16, #tpu.memory_space<vmem>>, %arg3: memref<384x128xbf16, #tpu.memory_space<vmem>>, %arg4: memref<64x128xbf16, #tpu.memory_space<vmem>>, %arg5: memref<1x128xf32, #tpu.memory_space<vmem>>, %arg6: memref<1x128xf32, #tpu.memory_space<vmem>>, %arg7: memref<1x128xf32, #tpu.memory_space<vmem>>, %arg8: memref<1x128xf32, #tpu.memory_space<vmem>>, %arg9: memref<16x128xbf16, #tpu.memory_space<vmem>>) attributes {dimension_semantics = [#tpu.dimension_semantics<parallel>], iteration_bounds = array<i64: 2>, scalar_prefetch = 0 : i64, scratch_operands = 0 : i64, tpu.core_type = #tpu.core_type<tc>, window_params = [{transform_indices = @transform_0, window_bounds = array<i64: 16, 64>}, {pipeline_mode = #tpu.pipeline_mode<synchronous>, transform_indices = @transform_1, window_bounds = array<i64: 192, 128>}, {pipeline_mode = #tpu.pipeline_mode<synchronous>, transform_indices = @transform_2, window_bounds = array<i64: 384, 128>}, {pipeline_mode = #tpu.pipeline_mode<synchronous>, transform_indices = @transform_3, window_bounds = array<i64: 64, 128>}, {pipeline_mode = #tpu.pipeline_mode<synchronous>, transform_indices = @transform_4, window_bounds = array<i64: 1, 128>}, {pipeline_mode = #tpu.pipeline_mode<synchronous>, transform_indices = @transform_5, window_bounds = array<i64: 1, 128>}, {pipeline_mode = #tpu.pipeline_mode<synchronous>, transform_indices = @transform_6, window_bounds = array<i64: 1, 128>}, {pipeline_mode = #tpu.pipeline_mode<synchronous>, transform_indices = @transform_7, window_bounds = array<i64: 1, 128>}, {transform_indices = @transform_8, window_bounds = array<i64: 16, 128>}]} {
    %0 = tpu.iota {dimensions = array<i32: 0>} : vector<16x1xi32>
    %c16_i32 = arith.constant 16 : i32
    %c0_i32 = arith.constant 0 : i32
    %1 = arith.cmpi eq, %c16_i32, %c0_i32 : i32
    %c1_i32 = arith.constant 1 : i32
    %2 = arith.select %1, %c1_i32, %c16_i32 : i32
    %3 = vector.broadcast %2 : i32 to vector<16x1xi32>
    %4 = arith.remsi %0, %3 : vector<16x1xi32>
    %c0_i32_0 = arith.constant 0 : i32
    %5 = vector.broadcast %c0_i32_0 : i32 to vector<16x1xi32>
    %6 = arith.cmpi ne, %4, %5 : vector<16x1xi32>
    %c0_i32_1 = arith.constant 0 : i32
    %7 = vector.broadcast %c0_i32_1 : i32 to vector<16x1xi32>
    %8 = arith.cmpi slt, %4, %7 : vector<16x1xi32>
    %c0_i32_2 = arith.constant 0 : i32
    %9 = arith.cmpi slt, %2, %c0_i32_2 : i32
    %10 = vector.broadcast %9 : i1 to vector<16x1xi1>
    %11 = vector.broadcast %10 : vector<16x1xi1> to vector<16x1xi1>
    %12 = arith.xori %8, %11 : vector<16x1xi1>
    %13 = arith.andi %12, %6 : vector<16x1xi1>
    %14 = vector.broadcast %2 : i32 to vector<16x1xi32>
    %15 = arith.addi %4, %14 : vector<16x1xi32>
    %16 = arith.select %13, %15, %4 : vector<16x1xi1>, vector<16x1xi32>
    %c-1_i32 = arith.constant -1 : i32
    %17 = vector.broadcast %c-1_i32 : i32 to vector<16x1xi32>
    %18 = arith.addi %16, %17 : vector<16x1xi32>
    %c0_i32_3 = arith.constant 0 : i32
    %19 = vector.broadcast %c0_i32_3 : i32 to vector<16x1xi32>
    %20 = arith.cmpi sge, %18, %19 : vector<16x1xi32>
    %c-1_i32_4 = arith.constant -1 : i32
    %21 = vector.broadcast %c-1_i32_4 : i32 to vector<16x1xi32>
    %22 = arith.addi %16, %21 : vector<16x1xi32>
    %c16_i32_5 = arith.constant 16 : i32
    %23 = vector.broadcast %c16_i32_5 : i32 to vector<16x1xi32>
    %24 = arith.cmpi slt, %22, %23 : vector<16x1xi32>
    %25 = arith.andi %20, %24 : vector<16x1xi1>
    %c1_i32_6 = arith.constant 1 : i32
    %26 = vector.broadcast %c1_i32_6 : i32 to vector<16x1xi32>
    %27 = arith.addi %16, %26 : vector<16x1xi32>
    %c0_i32_7 = arith.constant 0 : i32
    %28 = vector.broadcast %c0_i32_7 : i32 to vector<16x1xi32>
    %29 = arith.cmpi sge, %27, %28 : vector<16x1xi32>
    %c1_i32_8 = arith.constant 1 : i32
    %30 = vector.broadcast %c1_i32_8 : i32 to vector<16x1xi32>
    %31 = arith.addi %16, %30 : vector<16x1xi32>
    %c16_i32_9 = arith.constant 16 : i32
    %32 = vector.broadcast %c16_i32_9 : i32 to vector<16x1xi32>
    %33 = arith.cmpi slt, %31, %32 : vector<16x1xi32>
    %34 = arith.andi %29, %33 : vector<16x1xi1>
    %c0 = arith.constant 0 : index
    %c0_10 = arith.constant 0 : index
    %35 = vector.load %arg1[%c0, %c0_10] : memref<16x64xbf16, #tpu.memory_space<vmem>>, vector<16x64xbf16>
    %36 = arith.extf %35 : vector<16x64xbf16> to vector<16x64xf32>
    %c1_i32_11 = arith.constant 1 : i32
    %37 = tpu.dynamic_rotate %36 by %c1_i32_11 dim 0 : vector<16x64xf32>, i32 -> vector<16x64xf32>
    %cst = arith.constant 0.000000e+00 : f32
    %38 = vector.broadcast %cst : f32 to vector<16x64xf32>
    %39 = vector.shape_cast %25 : vector<16x1xi1> to vector<16x1xi1>
    %40 = vector.broadcast %39 : vector<16x1xi1> to vector<16x64xi1>
    %41 = arith.select %40, %37, %38 : vector<16x64xi1>, vector<16x64xf32>
    %c15_i32 = arith.constant 15 : i32
    %42 = tpu.dynamic_rotate %36 by %c15_i32 dim 0 : vector<16x64xf32>, i32 -> vector<16x64xf32>
    %cst_12 = arith.constant 0.000000e+00 : f32
    %43 = vector.broadcast %cst_12 : f32 to vector<16x64xf32>
    %44 = vector.shape_cast %34 : vector<16x1xi1> to vector<16x1xi1>
    %45 = vector.broadcast %44 : vector<16x1xi1> to vector<16x64xi1>
    %46 = arith.select %45, %42, %43 : vector<16x64xi1>, vector<16x64xf32>
    %47 = tpu.concatenate %41, %36, %46 in 1 : vector<16x64xf32>, vector<16x64xf32>, vector<16x64xf32> -> vector<16x192xf32>
    %48 = arith.truncf %47 : vector<16x192xf32> to vector<16x192xbf16>
    %c0_13 = arith.constant 0 : index
    %c0_14 = arith.constant 0 : index
    %49 = vector.load %arg2[%c0_13, %c0_14] : memref<192x128xbf16, #tpu.memory_space<vmem>>, vector<192x128xbf16>
    %cst_15 = arith.constant dense<0.000000e+00> : vector<16x128xf32>
    %50 = tpu.matmul %48, %49, %cst_15 {dimension_numbers = #tpu.dot_dimension_numbers<[1], [0], [0], [1], [0, 0, 1, 1], [], []>} : vector<16x192xbf16>, vector<192x128xbf16>, vector<16x128xf32> -> vector<16x128xf32>
    %c0_16 = arith.constant 0 : index
    %c0_17 = arith.constant 0 : index
    %51 = vector.load %arg5[%c0_16, %c0_17] : memref<1x128xf32, #tpu.memory_space<vmem>>, vector<1x128xf32>
    %52 = vector.broadcast %51 : vector<1x128xf32> to vector<16x128xf32>
    %53 = arith.mulf %50, %52 : vector<16x128xf32>
    %c0_18 = arith.constant 0 : index
    %c0_19 = arith.constant 0 : index
    %54 = vector.load %arg6[%c0_18, %c0_19] : memref<1x128xf32, #tpu.memory_space<vmem>>, vector<1x128xf32>
    %55 = vector.broadcast %54 : vector<1x128xf32> to vector<16x128xf32>
    %56 = arith.addf %53, %55 : vector<16x128xf32>
    %cst_20 = arith.constant 0.000000e+00 : f32
    %57 = vector.broadcast %cst_20 : f32 to vector<16x128xf32>
    %58 = arith.cmpf ogt, %56, %57 : vector<16x128xf32>
    %cst_21 = arith.constant 2.000000e-01 : f32
    %59 = vector.broadcast %cst_21 : f32 to vector<16x128xf32>
    %60 = arith.mulf %59, %56 : vector<16x128xf32>
    %61 = arith.select %58, %56, %60 : vector<16x128xi1>, vector<16x128xf32>
    %c1_i32_22 = arith.constant 1 : i32
    %62 = tpu.dynamic_rotate %61 by %c1_i32_22 dim 0 : vector<16x128xf32>, i32 -> vector<16x128xf32>
    %cst_23 = arith.constant 0.000000e+00 : f32
    %63 = vector.broadcast %cst_23 : f32 to vector<16x128xf32>
    %64 = vector.shape_cast %25 : vector<16x1xi1> to vector<16x1xi1>
    %65 = vector.broadcast %64 : vector<16x1xi1> to vector<16x128xi1>
    %66 = arith.select %65, %62, %63 : vector<16x128xi1>, vector<16x128xf32>
    %c15_i32_24 = arith.constant 15 : i32
    %67 = tpu.dynamic_rotate %61 by %c15_i32_24 dim 0 : vector<16x128xf32>, i32 -> vector<16x128xf32>
    %cst_25 = arith.constant 0.000000e+00 : f32
    %68 = vector.broadcast %cst_25 : f32 to vector<16x128xf32>
    %69 = vector.shape_cast %34 : vector<16x1xi1> to vector<16x1xi1>
    %70 = vector.broadcast %69 : vector<16x1xi1> to vector<16x128xi1>
    %71 = arith.select %70, %67, %68 : vector<16x128xi1>, vector<16x128xf32>
    %72 = tpu.concatenate %66, %61, %71 in 1 : vector<16x128xf32>, vector<16x128xf32>, vector<16x128xf32> -> vector<16x384xf32>
    %73 = arith.truncf %72 : vector<16x384xf32> to vector<16x384xbf16>
    %c0_26 = arith.constant 0 : index
    %c0_27 = arith.constant 0 : index
    %74 = vector.load %arg3[%c0_26, %c0_27] : memref<384x128xbf16, #tpu.memory_space<vmem>>, vector<384x128xbf16>
    %cst_28 = arith.constant dense<0.000000e+00> : vector<16x128xf32>
    %75 = tpu.matmul %73, %74, %cst_28 {dimension_numbers = #tpu.dot_dimension_numbers<[1], [0], [0], [1], [0, 0, 1, 1], [], []>} : vector<16x384xbf16>, vector<384x128xbf16>, vector<16x128xf32> -> vector<16x128xf32>
    %c0_29 = arith.constant 0 : index
    %c0_30 = arith.constant 0 : index
    %76 = vector.load %arg7[%c0_29, %c0_30] : memref<1x128xf32, #tpu.memory_space<vmem>>, vector<1x128xf32>
    %77 = vector.broadcast %76 : vector<1x128xf32> to vector<16x128xf32>
    %78 = arith.mulf %75, %77 : vector<16x128xf32>
    %c0_31 = arith.constant 0 : index
    %c0_32 = arith.constant 0 : index
    %79 = vector.load %arg8[%c0_31, %c0_32] : memref<1x128xf32, #tpu.memory_space<vmem>>, vector<1x128xf32>
    %80 = vector.broadcast %79 : vector<1x128xf32> to vector<16x128xf32>
    %81 = arith.addf %78, %80 : vector<16x128xf32>
    %c0_33 = arith.constant 0 : index
    %c0_34 = arith.constant 0 : index
    %82 = vector.load %arg1[%c0_33, %c0_34] : memref<16x64xbf16, #tpu.memory_space<vmem>>, vector<16x64xbf16>
    %c0_35 = arith.constant 0 : index
    %c0_36 = arith.constant 0 : index
    %83 = vector.load %arg4[%c0_35, %c0_36] : memref<64x128xbf16, #tpu.memory_space<vmem>>, vector<64x128xbf16>
    %cst_37 = arith.constant dense<0.000000e+00> : vector<16x128xf32>
    %84 = tpu.matmul %82, %83, %cst_37 {dimension_numbers = #tpu.dot_dimension_numbers<[1], [0], [0], [1], [0, 0, 1, 1], [], []>} : vector<16x64xbf16>, vector<64x128xbf16>, vector<16x128xf32> -> vector<16x128xf32>
    %85 = arith.addf %81, %84 : vector<16x128xf32>
    %cst_38 = arith.constant 0.000000e+00 : f32
    %86 = vector.broadcast %cst_38 : f32 to vector<16x128xf32>
    %87 = arith.cmpf ogt, %85, %86 : vector<16x128xf32>
    %cst_39 = arith.constant 2.000000e-01 : f32
    %88 = vector.broadcast %cst_39 : f32 to vector<16x128xf32>
    %89 = arith.mulf %88, %85 : vector<16x128xf32>
    %90 = arith.select %87, %85, %89 : vector<16x128xi1>, vector<16x128xf32>
    %91 = arith.truncf %90 : vector<16x128xf32> to vector<16x128xbf16>
    %c0_40 = arith.constant 0 : index
    %c0_41 = arith.constant 0 : index
    %92 = vector.load %arg9[%c0_40, %c0_41] : memref<16x128xbf16, #tpu.memory_space<vmem>>, vector<16x128xbf16>
    tpu.vector_store %arg9[%c0_40, %c0_41], %91 {strides = array<i32>} : memref<16x128xbf16, #tpu.memory_space<vmem>>, vector<16x128xbf16>,
    return
  }
  func.func @transform_0(%arg0: i32) -> (i32, i32) {
    %c0_i32 = arith.constant 0 : i32
    %c0_i32_0 = arith.constant 0 : i32
    return %arg0, %c0_i32 : i32, i32
  }
  func.func @transform_1(%arg0: i32) -> (i32, i32) {
    %c0_i32 = arith.constant 0 : i32
    %c0_i32_0 = arith.constant 0 : i32
    %c0_i32_1 = arith.constant 0 : i32
    return %c0_i32, %c0_i32_0 : i32, i32
  }
  func.func @transform_2(%arg0: i32) -> (i32, i32) {
    %c0_i32 = arith.constant 0 : i32
    %c0_i32_0 = arith.constant 0 : i32
    %c0_i32_1 = arith.constant 0 : i32
    return %c0_i32, %c0_i32_0 : i32, i32
  }
  func.func @transform_3(%arg0: i32) -> (i32, i32) {
    %c0_i32 = arith.constant 0 : i32
    %c0_i32_0 = arith.constant 0 : i32
    %c0_i32_1 = arith.constant 0 : i32
    return %c0_i32, %c0_i32_0 : i32, i32
  }
  func.func @transform_4(%arg0: i32) -> (i32, i32) {
    %c0_i32 = arith.constant 0 : i32
    %c0_i32_0 = arith.constant 0 : i32
    %c0_i32_1 = arith.constant 0 : i32
    return %c0_i32, %c0_i32_0 : i32, i32
  }
  func.func @transform_5(%arg0: i32) -> (i32, i32) {
    %c0_i32 = arith.constant 0 : i32
    %c0_i32_0 = arith.constant 0 : i32
    %c0_i32_1 = arith.constant 0 : i32
    return %c0_i32, %c0_i32_0 : i32, i32
  }
  func.func @transform_6(%arg0: i32) -> (i32, i32) {
    %c0_i32 = arith.constant 0 : i32
    %c0_i32_0 = arith.constant 0 : i32
    %c0_i32_1 = arith.constant 0 : i32
    return %c0_i32, %c0_i32_0 : i32, i32
  }
  func.func @transform_7(%arg0: i32) -> (i32, i32) {
    %c0_i32 = arith.constant 0 : i32
    %c0_i32_0 = arith.constant 0 : i32
    %c0_i32_1 = arith.constant 0 : i32
    return %c0_i32, %c0_i32_0 : i32, i32
  }
  func.func @transform_8(%arg0: i32) -> (i32, i32) {
    %c0_i32 = arith.constant 0 : i32
    %c0_i32_0 = arith.constant 0 : i32
    return %arg0, %c0_i32 : i32, i32
  }
}

</mosaic_0001>

<bundles_post_ra>
// kernel: residual_block_forward_slab.3
= control target key start
LH: loop header
LB: loop body
LE: loop exit
PB: predicated region body
PF: predicated region fallthrough
CT: control target
= control target key end

     0   :  { %s539_s9 = smov 0   ;;  %s600_s0 = inlined_call_operand.vmem [shape: bf16[32,64], index: 0, kind: input, shape index: {}]   ;;  %s601_s1 = inlined_call_operand.vmem [shape: bf16[192,128], index: 1, kind: input, shape index: {}]   ;;  %s602_s2 = inlined_call_operand.vmem [shape: f32[2,2,128], index: 2, kind: output, shape index: {}]  }
   0x1 LB: > { %s545_s10 = sadd.s32 4294967295, %s521_s9   ;;  %p430_p0 = scmp.ge.s32.totalorder %s521_s9, 1  ;;  %s521_s9 = sphi %s539_s9, %s12_s9  }
   0x2   : > { %p113_p1 = scmp.lt.s32.totalorder %s521_s9, 3 }
   0x4   : > { %p114_p2 = pnand %p430_p0, %p113_p1 }
   0x5   : > { %s431_s11 = sshll.u32 (!%p114_p2), %s545_s10, 1  ;;  %s523_s4 = smov (!%p114_p2), 64  }
   0x6   : > { %117 = sbr.rel (%p114_p2) target bundleno = 293 (0x125), region = 28  ;;  %p135_p3 = scmp.lt.s32.totalorder (!%p114_p2), %s431_s11, 3 }
   0x7   : > { %p140_p4 = scmp.lt.s32.totalorder (!%p114_p2), %s545_s10, 1 }
   0xb   : > { %v492_v0 = vld [vmem:[%s601_s1 + $0x38] sm:$0xff]  ;;  %v145_v1 = vlaneseq  ;;  %v491_v3 = vld [vmem:[%s601_s1 + $0x30] sm:$0xff]  ;;  %s604_s11 = smov (!%p135_p3, %s431_s11), 3  ;;  %v490_v7 = vld [vmem:[%s601_s1 + $0x28] sm:$0xff]  ;;  %vm222_vm2 = vcmask 523264   ;;  %s606_s10 = smov (!%p140_p4, %s545_s10), 1 }
   0xc   : > { %v496_v2 = vld [vmem:[%s601_s1 + $0x58] sm:$0xff]  ;;  %326 = vmatpush.bf16.msra.mxu0 %v492_v0  ;;  %v495_v5 = vld [vmem:[%s601_s1 + $0x50] sm:$0xff]  ;;  %s432_s20 = sshll.u32 %s604_s11, 2  ;;  %v494_v10 = vld [vmem:[%s601_s1 + $0x48] sm:$0xff]  ;;  %s433_s15 = sshll.u32 %s606_s10, 1  ;;  %vm370_vm5 = vcmask 1040384  }
   0xd   : > { %v146_v4 = vshrl.u32 %v145_v1, 7  ;;  %344 = vmatpush.bf16.msra.mxu1 %v496_v2  ;;  %s138_s23 = scalar_lea.vmem %s600_s0, %s432_s20  ;;  %v489_v15 = vld [vmem:[%s601_s1 + $0x20] sm:$0xff]  ;;  %v488_v22 = vld [vmem:[%s601_s1 + $0x18] sm:$0xff]  ;;  %v487_v24 = vld [vmem:[%s601_s1 + $0x10] sm:$0xff]  ;;  %s143_s18 = scalar_lea.vmem %s602_s2, %s433_s15 }
   0xe   : > { %v498_v9 = vld [vmem:[%s138_s23] sm:$0xff]   ;;  %v486_v25 = vld [vmem:[%s601_s1 + $0x8] sm:$0xff] }
   0xf   : > { %v147_v6 = vadd.s32 8, %v146_v4  ;;  %v499_v11 = vunpack.c.l.bf16 %v498_v9  ;;  %v500_v12 = vunpack.c.h.bf16 %v498_v9  ;;  %vm205_vm0 = vcmp.lt.s32.totalorder %v146_v4, 7  ;;  %v493_v18 = vld [vmem:[%s601_s1 + $0x40] sm:$0xff] }
  0x10   : > { %327 = vmatpush.bf16.msra.mxu0 %v491_v3  ;;  %v485_v26 = vld [vmem:[%s601_s1] sm:$0xff]  ;;  %v152_v27 = vand.u32 15, %v146_v4  ;;  %vm194_vm3 = vcmp.lt.s32.totalorder %v146_v4, 1 }
  0x11   : > { %v159_v8 = vand.u32 15, %v147_v6  ;;  %345 = vmatpush.bf16.msra.mxu1 %v495_v5  ;;  %v510_v14 = vpack.i.bf16 %v500_v12, %v499_v11  ;;  %v203_v16 = vrot.slane %v499_v11, 1  ;;  %v204_v17 = vrot.slane %v500_v12, 1 }
  0x12   : > { %v172_v28 = vadd.s32 4294967295, %v152_v27  ;;  %v192_v29 = vrot.slane %v499_v11, 7  ;;  %v193_v30 = vrot.slane %v500_v12, 7 }
  0x13   : > { %v181_v13 = vadd.s32 1, %v159_v8  ;;  %511 = vrot.lane.b32.xlu0 %v510_v14, %s523_s4  ;;  %v206_v19 = vsel %vm205_vm0, %v203_v16, %v204_v17  ;;  %v207_v20 = vsel %vm205_vm0, %v204_v17, %v203_v16 }
  0x14   : > { %328 = vmatpush.bf16.msra.mxu0 %v490_v7  ;;  %vm174_vm4 = vcmp.ge.s32.totalorder %v172_v28, 0  ;;  %v196_v31 = vsel %vm194_vm3, %v193_v30, %v192_v29  ;;  %v195_v33 = vsel %vm194_vm3, %v192_v29, %v193_v30 }
  0x15   : > { %vm185_vm1 = vcmp.lt.s32.totalorder %v181_v13, 16  ;;  %346 = vmatpush.bf16.msra.mxu1 %v494_v10  ;;  %v201_v34 = vsel %vm174_vm4, %v196_v31, 0.0 }
  0x16   : > { %v213_v21 = vsel %vm185_vm1, %v207_v20, 0.0 }
  0x17   : > { %v226_v23 = vpack.c.bf16 %v213_v21, %v206_v19 }
  0x18   : > { %329 = vmatpush.bf16.msra.mxu0 %v489_v15 }
  0x19   : > { %347 = vmatpush.bf16.msra.mxu1 %v493_v18 }
  0x1c   : > { %330 = vmatpush.bf16.msra.mxu0 %v488_v22  ;;  %482 = vmatmul.msk.bf16.vlgmr.msra.gmra.mxu1 %vm222_vm2, %v226_v23 }
  0x20   : > { %331 = vmatpush.bf16.msra.mxu0 %v487_v24 }
  0x24   : > { %332 = vmatpush.bf16.msra.mxu0 %v486_v25 }
  0x28   : > { %333 = vmatpush.bf16.msra.mxu0 %v485_v26 }
  0x85   : > { %v512_v32 = vpop.permute.xlu0 %511 }
  0x86   : > { %v514_v35 = vunpack.i.h.bf16 %v512_v32  ;;  %v513_v36 = vunpack.i.l.bf16 %v512_v32 }
  0x88   : > { %v223_v37 = vsel %vm222_vm2, %v201_v34, %v513_v36  ;;  %v224_v38 = vsel %vm222_vm2, %v195_v33, %v514_v35 }
  0x89   : > { %v225_v39 = vpack.c.bf16 %v224_v38, %v223_v37 }
  0x8b   : > { %334 = vmatmul.bf16.vlgmr.msra.gmra.mxu0 %v225_v39 }
  0x99   : > { %v349_v40 = vpop.f32.mrf.mxu1 }
  0xa1   : > { %v351_v43 = vpop.f32.mrf.mxu1 }
 0x108   : > { %v335_v41 = vpop.f32.mrf.mxu0 }
 0x109   : > { %v350_v42 = vadd.f32 %v349_v40, %v335_v41 }
 0x10b   : > { %v361_v46 = vmul.f32 %v350_v42, %v350_v42 }
 0x110   : > { %v337_v44 = vpop.f32.mrf.mxu0 }
 0x111   : > { %v352_v45 = vadd.f32 %v351_v43, %v337_v44 }
 0x113   : > { %v354_v47 = vadd.f32 %v352_v45, %v350_v42  ;;  %v362_v48 = vmul.f32 %v352_v45, %v352_v45 }
 0x115   : > { %v355_v49 = vrot.slane %v354_v47, 4  ;;  %v363_v50 = vadd.f32 %v362_v48, %v361_v46 }
 0x117   : > { %v356_v51 = vadd.f32 %v355_v49, %v354_v47  ;;  %v364_v52 = vrot.slane %v363_v50, 4 }
 0x119   : > { %v357_v53 = vrot.slane %v356_v51, 2  ;;  %v365_v54 = vadd.f32 %v364_v52, %v363_v50 }
 0x11b   : > { %v358_v55 = vadd.f32 %v357_v53, %v356_v51  ;;  %v366_v56 = vrot.slane %v365_v54, 2 }
 0x11d   : > { %v359_v57 = vrot.slane %v358_v55, 1  ;;  %v367_v58 = vadd.f32 %v366_v56, %v365_v54 }
 0x11f   : > { %v368_v59 = vrot.slane %v367_v58, 1  ;;  %v360_v60 = vadd.f32 %v359_v57, %v358_v55 }
 0x121   : > { %v369_v61 = vadd.f32 %v368_v59, %v367_v58 }
 0x123   : > { %v371_v62 = vsel %vm370_vm5, %v360_v60, %v369_v61 }
 0x124   : > { %372 = vst [vmem:[%s143_s18] sm:$0x3] %v371_v62 }
 0x125 PF: > { %s12_s9 = sadd.s32 1, %s521_s9  }
 0x126   : > { %p9_p5 = scmp.ge.s32.totalorder %s12_s9, 4  }
 0x128   :  { %11 = sbr.rel (!%p9_p5) target bundleno = 1 (0x1), region = 58 }

// kernel: residual_block_forward_slab.4
= control target key start
LH: loop header
LB: loop body
LE: loop exit
PB: predicated region body
PF: predicated region fallthrough
CT: control target
= control target key end

     0   :  { %s1032_s18 = smov 0   ;;  %s1207_s0 = inlined_call_operand.vmem [shape: bf16[32,64], index: 0, kind: input, shape index: {}]   ;;  %s1208_s1 = inlined_call_operand.vmem [shape: bf16[192,128], index: 1, kind: input, shape index: {}]   ;;  %s1209_s2 = inlined_call_operand.vmem [shape: bf16[384,128], index: 2, kind: input, shape index: {}]   ;;  %s1210_s3 = inlined_call_operand.vmem [shape: f32[1,128], index: 3, kind: input, shape index: {}]   ;;  %s1211_s4 = inlined_call_operand.vmem [shape: f32[1,128], index: 4, kind: input, shape index: {}]   ;;  %s1212_s5 = inlined_call_operand.vmem [shape: f32[2,2,128], index: 5, kind: output, shape index: {}]  }
   0x1 LB: > { %s1038_s19 = sadd.s32 4294967295, %s998_s18   ;;  %p778_p0 = scmp.ge.s32.totalorder %s998_s18, 1  ;;  %s998_s18 = sphi %s1032_s18, %s15_s18  }
   0x2   : > { %p188_p1 = scmp.lt.s32.totalorder %s998_s18, 3 }
   0x4   : > { %p189_p2 = pnand %p778_p0, %p188_p1 }
   0x5   : > { %s779_s20 = sshll.u32 (!%p189_p2), %s1038_s19, 1  ;;  %s1000_s16 = smov (!%p189_p2), 64  }
   0x6   : > { %192 = sbr.rel (%p189_p2) target bundleno = 449 (0x1c1), region = 40  ;;  %p216_p3 = scmp.lt.s32.totalorder (!%p189_p2), %s779_s20, 3 }
   0x7   : > { %p221_p4 = scmp.lt.s32.totalorder (!%p189_p2), %s1038_s19, 1 }
   0xb   : > { %v942_v0 = vld [vmem:[%s1208_s1 + $0x38] sm:$0xff]  ;;  %v226_v1 = vlaneseq  ;;  %v941_v3 = vld [vmem:[%s1208_s1 + $0x30] sm:$0xff]  ;;  %s1214_s20 = smov (!%p216_p3, %s779_s20), 3  ;;  %v940_v7 = vld [vmem:[%s1208_s1 + $0x28] sm:$0xff]  ;;  %vm303_vm2 = vcmask 523264   ;;  %vm1001_vm7 = vmmov 1  }
   0xc   : > { %v946_v2 = vld [vmem:[%s1208_s1 + $0x58] sm:$0xff]  ;;  %407 = vmatpush.bf16.msra.mxu0 %v942_v0  ;;  %v945_v5 = vld [vmem:[%s1208_s1 + $0x50] sm:$0xff]  ;;  %s780_s29 = sshll.u32 %s1214_s20, 2  ;;  %v944_v10 = vld [vmem:[%s1208_s1 + $0x48] sm:$0xff]  ;;  %s1216_s19 = smov (!%p221_p4, %s1038_s19), 1  ;;  %vm718_vm10 = vcmask 1040384  }
   0xd   : > { %v1052_v4 = vshrl.u32 %v226_v1, 7  ;;  %425 = vmatpush.bf16.msra.mxu1 %v946_v2  ;;  %s219_s7 = scalar_lea.vmem %s1207_s0, %s780_s29  ;;  %v939_v15 = vld [vmem:[%s1208_s1 + $0x20] sm:$0xff]  ;;  %v938_v22 = vld [vmem:[%s1208_s1 + $0x18] sm:$0xff]  ;;  %v937_v24 = vld [vmem:[%s1208_s1 + $0x10] sm:$0xff]  ;;  %s781_s8 = sshll.u32 %s1216_s19, 1 }
   0xe   : > { %v972_v9 = vld [vmem:[%s219_s7] sm:$0xff]   ;;  %v936_v25 = vld [vmem:[%s1208_s1 + $0x8] sm:$0xff]  ;;  %v962_v27 = vld [vmem:[%s1209_s2 + $0x78] sm:$0xff]  ;;  %s224_s11 = scalar_lea.vmem %s1212_s5, %s781_s8 }
   0xf   : > { %v228_v6 = vadd.s32 8, %v1052_v4  ;;  %v973_v11 = vunpack.c.l.bf16 %v972_v9  ;;  %v974_v12 = vunpack.c.h.bf16 %v972_v9  ;;  %vm286_vm0 = vcmp.lt.s32.totalorder %v1052_v4, 7  ;;  %v943_v18 = vld [vmem:[%s1208_s1 + $0x40] sm:$0xff]  ;;  %674 = vmatpush.bf16.msra.mxu3 %v962_v27  ;;  %v954_v28 = vld [vmem:[%s1209_s2 + $0x38] sm:$0xff]  ;;  %v961_v30 = vld [vmem:[%s1209_s2 + $0x70] sm:$0xff] }
  0x10   : > { %408 = vmatpush.bf16.msra.mxu0 %v941_v3  ;;  %v935_v26 = vld [vmem:[%s1208_s1] sm:$0xff]  ;;  %v970_v29 = vld [vmem:[%s1209_s2 + $0xb8] sm:$0xff]  ;;  %660 = vmatpush.bf16.msra.mxu2 %v954_v28  ;;  %v953_v31 = vld [vmem:[%s1209_s2 + $0x30] sm:$0xff]  ;;  %v233_v34 = vand.u32 15, %v1052_v4  ;;  %vm275_vm3 = vcmp.lt.s32.totalorder %v1052_v4, 1 }
  0x11   : > { %v240_v8 = vand.u32 15, %v228_v6  ;;  %426 = vmatpush.bf16.msra.mxu1 %v945_v5  ;;  %v985_v14 = vpack.i.bf16 %v974_v12, %v973_v11  ;;  %v284_v16 = vrot.slane %v973_v11, 1  ;;  %v285_v17 = vrot.slane %v974_v12, 1  ;;  %v969_v32 = vld [vmem:[%s1209_s2 + $0xb0] sm:$0xff]  ;;  %v960_v33 = vld [vmem:[%s1209_s2 + $0x68] sm:$0xff]  ;;  %v959_v49 = vld [vmem:[%s1209_s2 + $0x60] sm:$0xff] }
  0x12   : > { %v1118_v35 = vadd.s32 4294967295, %v233_v34  ;;  %v273_v36 = vrot.slane %v973_v11, 7  ;;  %v274_v37 = vrot.slane %v974_v12, 7  ;;  %v952_v47 = vld [vmem:[%s1209_s2 + $0x28] sm:$0xff]  ;;  %v951_v50 = vld [vmem:[%s1209_s2 + $0x20] sm:$0xff]  ;;  %v958_v52 = vld [vmem:[%s1209_s2 + $0x58] sm:$0xff] }
  0x13   : > { %v1067_v13 = vadd.s32 1, %v240_v8  ;;  %986 = vrot.lane.b32.xlu0 %v985_v14, %s1000_s16  ;;  %v287_v19 = vsel %vm286_vm0, %v284_v16, %v285_v17  ;;  %v288_v20 = vsel %vm286_vm0, %v285_v17, %v284_v16  ;;  %675 = vmatpush.bf16.msra.mxu3 %v961_v30  ;;  %v968_v48 = vld [vmem:[%s1209_s2 + $0xa8] sm:$0xff]  ;;  %v967_v51 = vld [vmem:[%s1209_s2 + $0xa0] sm:$0xff]  ;;  %v950_v53 = vld [vmem:[%s1209_s2 + $0x18] sm:$0xff] }
  0x14   : > { %409 = vmatpush.bf16.msra.mxu0 %v940_v7  ;;  %661 = vmatpush.bf16.msra.mxu2 %v953_v31  ;;  %vm255_vm4 = vcmp.ge.s32.totalorder %v1118_v35, 0  ;;  %v277_v38 = vsel %vm275_vm3, %v274_v37, %v273_v36  ;;  %v276_v40 = vsel %vm275_vm3, %v273_v36, %v274_v37  ;;  %v966_v54 = vld [vmem:[%s1209_s2 + $0x98] sm:$0xff]  ;;  %v957_v55 = vld [vmem:[%s1209_s2 + $0x50] sm:$0xff]  ;;  %v956_v58 = vld [vmem:[%s1209_s2 + $0x48] sm:$0xff] }
  0x15   : > { %vm266_vm1 = vcmp.lt.s32.totalorder %v1067_v13, 16  ;;  %427 = vmatpush.bf16.msra.mxu1 %v944_v10  ;;  %v282_v41 = vsel %vm255_vm4, %v277_v38, 0.0  ;;  %v949_v56 = vld [vmem:[%s1209_s2 + $0x10] sm:$0xff]  ;;  %v948_v59 = vld [vmem:[%s1209_s2 + $0x8] sm:$0xff]  ;;  %v955_v61 = vld [vmem:[%s1209_s2 + $0x40] sm:$0xff] }
  0x16   : > { %v294_v21 = vsel %vm266_vm1, %v288_v20, 0.0  ;;  %v965_v57 = vld [vmem:[%s1209_s2 + $0x90] sm:$0xff]  ;;  %v964_v60 = vld [vmem:[%s1209_s2 + $0x88] sm:$0xff]  ;;  %v947_v62 = vld [vmem:[%s1209_s2] sm:$0xff] }
  0x17   : > { %v307_v23 = vpack.c.bf16 %v294_v21, %v287_v19  ;;  %676 = vmatpush.bf16.msra.mxu3 %v960_v33  ;;  %v963_v63 = vld [vmem:[%s1209_s2 + $0x80] sm:$0xff]  ;;  %vm927_vm8 = vmpackc.low %vm1001_vm7, %vm255_vm4 }
  0x18   : > { %410 = vmatpush.bf16.msra.mxu0 %v939_v15  ;;  %662 = vmatpush.bf16.msra.mxu2 %v952_v47  ;;  %v990_v1 = vld [vmem:[%s1210_s3] ss:$0 sm:$0xff]  ;;  %vm930_vm9 = vmpackc.low %vm266_vm1, %vm1001_vm7 }
  0x19   : > { %428 = vmatpush.bf16.msra.mxu1 %v943_v18  ;;  %v991_v5 = vld [vmem:[%s1211_s4] ss:$0 sm:$0xff] }
  0x1b   : > { %677 = vmatpush.bf16.msra.mxu3 %v959_v49 }
  0x1c   : > { %411 = vmatpush.bf16.msra.mxu0 %v938_v22  ;;  %830 = vmatmul.msk.bf16.vlgmr.msra.gmra.mxu1 %vm303_vm2, %v307_v23 }
  0x1d   : > { %688 = vmatpush.bf16.msrb.mxu1 %v970_v29  ;;  %663 = vmatpush.bf16.msra.mxu2 %v951_v50 }
  0x1f   : > { %678 = vmatpush.bf16.msra.mxu3 %v958_v52 }
  0x20   : > { %412 = vmatpush.bf16.msra.mxu0 %v937_v24 }
  0x21   : > { %689 = vmatpush.bf16.msrb.mxu1 %v969_v32  ;;  %664 = vmatpush.bf16.msra.mxu2 %v950_v53 }
  0x23   : > { %679 = vmatpush.bf16.msra.mxu3 %v957_v55 }
  0x24   : > { %413 = vmatpush.bf16.msra.mxu0 %v936_v25 }
  0x25   : > { %690 = vmatpush.bf16.msrb.mxu1 %v968_v48  ;;  %665 = vmatpush.bf16.msra.mxu2 %v949_v56 }
  0x27   : > { %680 = vmatpush.bf16.msra.mxu3 %v956_v58 }
  0x28   : > { %414 = vmatpush.bf16.msra.mxu0 %v935_v26 }
  0x29   : > { %691 = vmatpush.bf16.msrb.mxu1 %v967_v51  ;;  %666 = vmatpush.bf16.msra.mxu2 %v948_v59 }
  0x2b   : > { %681 = vmatpush.bf16.msra.mxu3 %v955_v61 }
  0x2d   : > { %692 = vmatpush.bf16.msrb.mxu1 %v966_v54  ;;  %667 = vmatpush.bf16.msra.mxu2 %v947_v62 }
  0x31   : > { %693 = vmatpush.bf16.msrb.mxu1 %v965_v57 }
  0x35   : > { %694 = vmatpush.bf16.msrb.mxu1 %v964_v60 }
  0x39   : > { %695 = vmatpush.bf16.msrb.mxu1 %v963_v63 }
  0x85   : > { %v987_v39 = vpop.permute.xlu0 %986 }
  0x86   : > { %v989_v42 = vunpack.i.h.bf16 %v987_v39  ;;  %v988_v43 = vunpack.i.l.bf16 %v987_v39 }
  0x88   : > { %v304_v44 = vsel %vm303_vm2, %v282_v41, %v988_v43  ;;  %v305_v45 = vsel %vm303_vm2, %v276_v40, %v989_v42 }
  0x89   : > { %v306_v46 = vpack.c.bf16 %v305_v45, %v304_v44 }
  0x8b   : > { %415 = vmatmul.bf16.vlgmr.msra.gmra.mxu0 %v306_v46 }
  0x99   : > { %v430_v0 = vpop.f32.mrf.mxu1 }
  0xa1   : > { %v432_v8 = vpop.f32.mrf.mxu1 }
 0x108   : > { %v416_v2 = vpop.f32.mrf.mxu0 }
 0x109   : > { %v431_v3 = vadd.f32 %v430_v0, %v416_v2 }
 0x10b   : > { %v439_v6 = vmul.f32 %v990_v1, %v431_v3 }
 0x10d   : > { %v445_v7 = vadd.f32 %v991_v5, %v439_v6 }
 0x10f   : > { %v449_v11 = vmul.f32 0.2, %v445_v7  ;;  %vm447_vm5 = vcmp.gt.f32.partialorder %v445_v7, 0.0 }
 0x110   : > { %v418_v9 = vpop.f32.mrf.mxu0 }
 0x111   : > { %v433_v10 = vadd.f32 %v432_v8, %v418_v9  ;;  %v451_v15 = vsel %vm447_vm5, %v445_v7, %v449_v11 }
 0x112   : > { %v453_v18 = vrot.slane %v451_v15, 7  ;;  %v459_v20 = vrot.slane %v451_v15, 1 }
 0x113   : > { %v440_v12 = vmul.f32 %v990_v1, %v433_v10 }
 0x115   : > { %v446_v14 = vadd.f32 %v991_v5, %v440_v12 }
 0x117   : > { %vm448_vm6 = vcmp.gt.f32.partialorder %v446_v14, 0.0  ;;  %v450_v16 = vmul.f32 0.2, %v446_v14 }
 0x119   : > { %v452_v17 = vsel %vm448_vm6, %v446_v14, %v450_v16 }
 0x11a   : > { %v454_v19 = vrot.slane %v452_v17, 7  ;;  %v460_v21 = vrot.slane %v452_v17, 1  ;;  %v466_v22 = vpack.c.bf16 %v452_v17, %v451_v15 }
 0x11c   : > { %682 = vmatmul.bf16.vlgmr.msra.gmra.mxu3 %v466_v22  ;;  %v455_v23 = vsel %vm275_vm3, %v453_v18, %v454_v19  ;;  %v456_v24 = vsel %vm275_vm3, %v454_v19, %v453_v18  ;;  %v461_v25 = vsel %vm286_vm0, %v459_v20, %v460_v21  ;;  %v462_v26 = vsel %vm286_vm0, %v460_v21, %v459_v20 }
 0x11d   : > { %v928_v27 = vpack.c.bf16 %v455_v23, %v456_v24  ;;  %v931_v28 = vpack.c.bf16 %v462_v26, %v461_v25 }
 0x11f   : > { %929 = vmatmul.msk.bf16.vlgmr.msra.gmra.mxu2 %vm927_vm8, %v928_v27  ;;  %932 = vmatmul.msk.bf16.vlgmr.msrb.gmra.mxu1 %vm930_vm9, %v931_v28 }
 0x19c   : > { %v697_v30 = vpop.f32.mrf.mxu1 }
 0x19f   : > { %v683_v29 = vpop.f32.mrf.mxu3 }
 0x1a2   : > { %v669_v31 = vpop.f32.mrf.mxu2 }
 0x1a3   : > { %v684_v32 = vadd.f32 %v683_v29, %v669_v31 }
 0x1a4   : > { %v699_v37 = vpop.f32.mrf.mxu1 }
 0x1a5   : > { %v698_v35 = vadd.f32 %v697_v30, %v684_v32 }
 0x1a7   : > { %v685_v33 = vpop.f32.mrf.mxu3  ;;  %v709_v38 = vmul.f32 %v698_v35, %v698_v35 }
 0x1aa   : > { %v671_v34 = vpop.f32.mrf.mxu2 }
 0x1ab   : > { %v686_v36 = vadd.f32 %v685_v33, %v671_v34 }
 0x1ad   : > { %v700_v4 = vadd.f32 %v699_v37, %v686_v36 }
 0x1af   : > { %v702_v39 = vadd.f32 %v700_v4, %v698_v35  ;;  %v710_v13 = vmul.f32 %v700_v4, %v700_v4 }
 0x1b1   : > { %v703_v40 = vrot.slane %v702_v39, 4  ;;  %v711_v41 = vadd.f32 %v710_v13, %v709_v38 }
 0x1b3   : > { %v704_v42 = vadd.f32 %v703_v40, %v702_v39  ;;  %v712_v43 = vrot.slane %v711_v41, 4 }
 0x1b5   : > { %v705_v44 = vrot.slane %v704_v42, 2  ;;  %v713_v45 = vadd.f32 %v712_v43, %v711_v41 }
 0x1b7   : > { %v706_v46 = vadd.f32 %v705_v44, %v704_v42  ;;  %v714_v47 = vrot.slane %v713_v45, 2 }
 0x1b9   : > { %v707_v48 = vrot.slane %v706_v46, 1  ;;  %v715_v49 = vadd.f32 %v714_v47, %v713_v45 }
 0x1bb   : > { %v716_v50 = vrot.slane %v715_v49, 1  ;;  %v708_v51 = vadd.f32 %v707_v48, %v706_v46 }
 0x1bd   : > { %v717_v52 = vadd.f32 %v716_v50, %v715_v49 }
 0x1bf   : > { %v719_v53 = vsel %vm718_vm10, %v708_v51, %v717_v52 }
 0x1c0   : > { %720 = vst [vmem:[%s224_s11] sm:$0x3] %v719_v53 }
 0x1c1 PF: > { %s15_s18 = sadd.s32 1, %s998_s18  }
 0x1c2   : > { %p12_p5 = scmp.ge.s32.totalorder %s15_s18, 4  }
 0x1c4   :  { %14 = sbr.rel (!%p12_p5) target bundleno = 1 (0x1), region = 70 }

// kernel: residual_block_forward_slab.5
= control target key start
LH: loop header
LB: loop body
LE: loop exit
PB: predicated region body
PF: predicated region fallthrough
CT: control target
= control target key end

     0   :  { %13 = vsyncpa [#allocation3], 0  ;;  %s1600_s0 = inlined_call_operand.vmem [shape: bf16[32,64], index: 0, kind: input, shape index: {}]   ;;  %s1601_s1 = inlined_call_operand.vmem [shape: bf16[192,128], index: 1, kind: input, shape index: {}]   ;;  %s1602_s2 = inlined_call_operand.vmem [shape: bf16[384,128], index: 2, kind: input, shape index: {}]   ;;  %s1603_s3 = inlined_call_operand.vmem [shape: bf16[64,128], index: 3, kind: input, shape index: {}]   ;;  %s1604_s4 = inlined_call_operand.vmem [shape: f32[1,128], index: 4, kind: input, shape index: {}]   ;;  %s1605_s5 = inlined_call_operand.vmem [shape: f32[1,128], index: 5, kind: input, shape index: {}]   ;;  %s1606_s6 = inlined_call_operand.vmem [shape: f32[1,128], index: 6, kind: input, shape index: {}]   ;;  %s1607_s7 = inlined_call_operand.vmem [shape: f32[1,128], index: 7, kind: input, shape index: {}]   ;;  %s1608_s8 = inlined_call_operand.hbm [shape: bf16[32,128], index: 8, kind: output, shape index: {}]  }
   0x1   :  { %15 = vsyncpa [#allocation3 + $0x1], 0  ;;  %s1334_s27 = smov 0   ;;  %s1336_s28 = smov 0  }
   0x2   :  { %s1338_s29 = smov 0   ;;  %s1340_s30 = smov 0  }
   0x3 LB: > { %s1355_s9 = sadd.s32 4294967295, %s1284_s30   ;;  %s940_s10 = sadd.s32 4294967294, %s1284_s30   ;;  %s1284_s30 = sphi %s1340_s30, %s1614_s30   ;;  %s1280_s29 = sphi %s1338_s29, %s1613_s29   ;;  %s1276_s28 = sphi %s1336_s28, %s1612_s28   ;;  %s1272_s27 = sphi %s1334_s27, %s1611_s27  }
   0x4   : > { %s1359_s11 = sadd.s32 1, %s1284_s30   ;;  %s201_s12 = sadd.s32 1, %s1280_s29 }
   0x5   : > { %s198_s13 = ssub.s32 %s1284_s30, %s1359_s11  ;;  %p211_p0 = scmp.ne.s32.totalorder %s1280_s29, %s1276_s28 }
   0x6   : > { %p199_p1 = scmp.eq.s32.totalorder %s198_s13, 0  ;;  %p212_p2 = scmp.eq.s32.totalorder %s1355_s9, 1 }
   0x7   : > { %p217_p3 = scmp.ne.s32.totalorder %s1276_s28, %s1272_s27  ;;  %p218_p4 = scmp.eq.s32.totalorder %s940_s10, 1 }
   0x8   : > { %s1370_s14 = scalar_select %p199_p1, %s1280_s29, %s201_s12  }
   0x9   : > { %p1372_p5 = por %p212_p2, %p211_p0  ;;  %p1376_p6 = por %p218_p4, %p217_p3 }
   0xa   : > { %p943_p7 = scmp.ge.s32.totalorder %s1284_s30, 1  ;;  %p266_p8 = scmp.lt.s32.totalorder %s1284_s30, 3 }
   0xc   : > { %p267_p9 = pnand %p943_p7, %p266_p8 }
   0xd   : > { %s945_s17 = sshll.u32 (!%p267_p9), %s1355_s9, 1  ;;  %s1286_s25 = smov (!%p267_p9), 64  }
   0xe   : > { %270 = sbr.rel (%p267_p9) target bundleno = 454 (0x1c6), region = 52  ;;  %p301_p10 = scmp.lt.s32.totalorder (!%p267_p9), %s945_s17, 3 }
   0xf   : > { %s297_s20 = sand.u32 (!%p267_p9), 1, %s1276_s28  }
  0x10   : > { %s944_s21 = sshll.u32 (!%p267_p9), %s297_s20, 3 }
  0x13   : > { %v1132_v0 = vld [vmem:[%s1601_s1 + $0x38] sm:$0xff]  ;;  %v308_v1 = vlaneseq  ;;  %v1131_v3 = vld [vmem:[%s1601_s1 + $0x30] sm:$0xff]  ;;  %s1616_s17 = smov (!%p301_p10, %s945_s17), 3  ;;  %v1130_v7 = vld [vmem:[%s1601_s1 + $0x28] sm:$0xff]  ;;  %vm385_vm2 = vcmask 523264   ;;  %vm1287_vm7 = vmmov 1  }
  0x14   : > { %v1136_v2 = vld [vmem:[%s1601_s1 + $0x58] sm:$0xff]  ;;  %489 = vmatpush.bf16.msra.mxu0 %v1132_v0  ;;  %v1135_v5 = vld [vmem:[%s1601_s1 + $0x50] sm:$0xff]  ;;  %s946_s26 = sshll.u32 %s1616_s17, 2  ;;  %v1134_v10 = vld [vmem:[%s1601_s1 + $0x48] sm:$0xff]  ;;  %s1165_s17 = sshll.u32 %s1355_s9, 3 }
  0x15   : > { %v1392_v4 = vshrl.u32 %v308_v1, 7  ;;  %507 = vmatpush.bf16.msra.mxu1 %v1136_v2  ;;  %s1401_s13 = scalar_lea.vmem %s1600_s0, %s946_s26  ;;  %v1129_v15 = vld [vmem:[%s1601_s1 + $0x20] sm:$0xff]  ;;  %v1128_v22 = vld [vmem:[%s1601_s1 + $0x18] sm:$0xff]  ;;  %v1127_v24 = vld [vmem:[%s1601_s1 + $0x10] sm:$0xff]  ;;  %s874_s24 = scalar_lea.hbm %s1608_s8, %s1165_s17 }
  0x16   : > { %v351_v9 = vld [vmem:[%s1401_s13] sm:$0xff]   ;;  %v1126_v25 = vld [vmem:[%s1601_s1 + $0x8] sm:$0xff]  ;;  %v1152_v27 = vld [vmem:[%s1602_s2 + $0x78] sm:$0xff]  ;;  %s299_s26 = scalar_lea.vmem [#allocation2], %s944_s21  ;;  %s863_s9 = scalar_lea.sflag [#allocation3], %s297_s20 }
  0x17   : > { %v310_v6 = vadd.s32 8, %v1392_v4  ;;  %v353_v11 = vunpack.c.l.bf16 %v351_v9  ;;  %v354_v12 = vunpack.c.h.bf16 %v351_v9  ;;  %vm368_vm0 = vcmp.lt.s32.totalorder %v1392_v4, 7  ;;  %v1133_v18 = vld [vmem:[%s1601_s1 + $0x40] sm:$0xff]  ;;  %756 = vmatpush.bf16.msra.mxu3 %v1152_v27  ;;  %v1144_v28 = vld [vmem:[%s1602_s2 + $0x38] sm:$0xff]  ;;  %v1151_v30 = vld [vmem:[%s1602_s2 + $0x70] sm:$0xff]  ;;  %s1568_s10 = sshll.u32 %s299_s26, 4  ;;  %s876_s10 = int_to_ptr.vmem [resolvable:$true] %s1568_s10 }
  0x18   : > { %490 = vmatpush.bf16.msra.mxu0 %v1131_v3  ;;  %v1125_v26 = vld [vmem:[%s1601_s1] sm:$0xff]  ;;  %v1160_v29 = vld [vmem:[%s1602_s2 + $0xb8] sm:$0xff]  ;;  %742 = vmatpush.bf16.msra.mxu2 %v1144_v28  ;;  %v1143_v31 = vld [vmem:[%s1602_s2 + $0x30] sm:$0xff]  ;;  %v315_v34 = vand.u32 15, %v1392_v4  ;;  %vm357_vm3 = vcmp.lt.s32.totalorder %v1392_v4, 1  ;;  %s1242_s17 = scalar_lea.hbm %s1608_s8, 16 }
  0x19   : > { %v322_v8 = vand.u32 15, %v310_v6  ;;  %508 = vmatpush.bf16.msra.mxu1 %v1135_v5  ;;  %v1213_v14 = vpack.i.bf16 %v354_v12, %v353_v11  ;;  %v366_v16 = vrot.slane %v353_v11, 1  ;;  %v367_v17 = vrot.slane %v354_v12, 1  ;;  %v1159_v32 = vld [vmem:[%s1602_s2 + $0xb0] sm:$0xff]  ;;  %v1150_v33 = vld [vmem:[%s1602_s2 + $0x68] sm:$0xff]  ;;  %v1149_v49 = vld [vmem:[%s1602_s2 + $0x60] sm:$0xff] }
  0x1a   : > { %v1462_v35 = vadd.s32 4294967295, %v315_v34  ;;  %v355_v36 = vrot.slane %v353_v11, 7  ;;  %v356_v37 = vrot.slane %v354_v12, 7  ;;  %v1142_v47 = vld [vmem:[%s1602_s2 + $0x28] sm:$0xff]  ;;  %v1141_v50 = vld [vmem:[%s1602_s2 + $0x20] sm:$0xff]  ;;  %v1148_v52 = vld [vmem:[%s1602_s2 + $0x58] sm:$0xff] }
  0x1b   : > { %v1410_v13 = vadd.s32 1, %v322_v8  ;;  %1214 = vrot.lane.b32.xlu0 %v1213_v14, %s1286_s25  ;;  %v369_v19 = vsel %vm368_vm0, %v366_v16, %v367_v17  ;;  %v370_v20 = vsel %vm368_vm0, %v367_v17, %v366_v16  ;;  %757 = vmatpush.bf16.msra.mxu3 %v1151_v30  ;;  %v1158_v48 = vld [vmem:[%s1602_s2 + $0xa8] sm:$0xff]  ;;  %v1157_v51 = vld [vmem:[%s1602_s2 + $0xa0] sm:$0xff]  ;;  %v1140_v53 = vld [vmem:[%s1602_s2 + $0x18] sm:$0xff] }
  0x1c   : > { %491 = vmatpush.bf16.msra.mxu0 %v1130_v7  ;;  %743 = vmatpush.bf16.msra.mxu2 %v1143_v31  ;;  %vm337_vm4 = vcmp.ge.s32.totalorder %v1462_v35, 0  ;;  %v359_v38 = vsel %vm357_vm3, %v356_v37, %v355_v36  ;;  %v358_v40 = vsel %vm357_vm3, %v355_v36, %v356_v37  ;;  %v1156_v54 = vld [vmem:[%s1602_s2 + $0x98] sm:$0xff]  ;;  %v1147_v55 = vld [vmem:[%s1602_s2 + $0x50] sm:$0xff]  ;;  %v1146_v58 = vld [vmem:[%s1602_s2 + $0x48] sm:$0xff] }
  0x1d   : > { %vm348_vm1 = vcmp.lt.s32.totalorder %v1410_v13, 16  ;;  %509 = vmatpush.bf16.msra.mxu1 %v1134_v10  ;;  %v364_v41 = vsel %vm337_vm4, %v359_v38, 0.0  ;;  %v1139_v56 = vld [vmem:[%s1602_s2 + $0x10] sm:$0xff]  ;;  %v1164_v59 = vld [vmem:[%s1603_s3 + $0x18] sm:$0xff]  ;;  %v1138_v60 = vld [vmem:[%s1602_s2 + $0x8] sm:$0xff] }
  0x1e   : > { %v376_v21 = vsel %vm348_vm1, %v370_v20, 0.0  ;;  %v1155_v57 = vld [vmem:[%s1602_s2 + $0x90] sm:$0xff]  ;;  %v1154_v61 = vld [vmem:[%s1602_s2 + $0x88] sm:$0xff]  ;;  %v1145_v62 = vld [vmem:[%s1602_s2 + $0x40] sm:$0xff] }
  0x1f   : > { %v389_v23 = vpack.c.bf16 %v376_v21, %v369_v19  ;;  %758 = vmatpush.bf16.msra.mxu3 %v1150_v33  ;;  %v1163_v63 = vld [vmem:[%s1603_s3 + $0x10] sm:$0xff]  ;;  %v1137_v0 = vld [vmem:[%s1602_s2] sm:$0xff]  ;;  %v1162_v2 = vld [vmem:[%s1603_s3 + $0x8] sm:$0xff] }
  0x20   : > { %492 = vmatpush.bf16.msra.mxu0 %v1129_v15  ;;  %744 = vmatpush.bf16.msra.mxu2 %v1142_v47  ;;  %v1153_v1 = vld [vmem:[%s1602_s2 + $0x80] sm:$0xff]  ;;  %vm1092_vm8 = vmpackc.low %vm1287_vm7, %vm337_vm4 }
  0x21   : > { %510 = vmatpush.bf16.msra.mxu1 %v1133_v18  ;;  %v1161_v3 = vld [vmem:[%s1603_s3] sm:$0xff]  ;;  %vm1095_vm9 = vmpackc.low %vm348_vm1, %vm1287_vm7 }
  0x22   : > { %v1124_v5 = vld [vmem:[%s1401_s13] sm:$0xff]  ;;  %s877_s13 = sshll.u32 %s874_s24, 4  ;;  %s878_s13 = int_to_ptr.hbm [resolvable:$true] %s877_s13 }
  0x23   : > { %759 = vmatpush.bf16.msra.mxu3 %v1149_v49  ;;  %v1218_v7 = vld [vmem:[%s1604_s4] ss:$0 sm:$0xff]  ;;  %s1236_s12 = sshra.s32 %s878_s13, 4  ;;  %s1237_s12 = int_to_ptr.hbm [resolvable:$true] %s1236_s12 }
  0x24   : > { %493 = vmatpush.bf16.msra.mxu0 %v1128_v22  ;;  %995 = vmatmul.msk.bf16.vlgmr.msra.gmra.mxu1 %vm385_vm2, %v389_v23  ;;  %v1219_v10 = vld [vmem:[%s1605_s5] ss:$0 sm:$0xff]  ;;  %s1238_s18 = scalar_lea.hbm %s1237_s12, 8  ;;  %p1243_p0 = scmp.lt.s32.totalorder %s1237_s12, %s1608_s8 }
  0x25   : > { %770 = vmatpush.bf16.msrb.mxu1 %v1160_v29  ;;  %745 = vmatpush.bf16.msra.mxu2 %v1141_v50  ;;  %v1220_v38 = vld [vmem:[%s1606_s6] ss:$0 sm:$0xff]  ;;  %p1239_p11 = scmp.ne.s32.totalorder %s1237_s12, %s1238_s18  ;;  %p1244_p1 = scmp.lt.s32.totalorder %s1242_s17, %s1238_s18 }
  0x26   : > { %v1221_v13 = vld [vmem:[%s1607_s7] ss:$0 sm:$0xff] }
  0x27   : > { %760 = vmatpush.bf16.msra.mxu3 %v1148_v52  ;;  %p1240_p12 = pnand %p1239_p11, %p1372_p5  ;;  %p1245_p2 = por %p1244_p1, %p1243_p0 }
  0x28   : > { %494 = vmatpush.bf16.msra.mxu0 %v1127_v24 }
  0x29   : > { %771 = vmatpush.bf16.msrb.mxu1 %v1159_v32  ;;  %746 = vmatpush.bf16.msra.mxu2 %v1140_v53  ;;  %p1241_p13 = pneg %p1240_p12 }
  0x2b   : > { %761 = vmatpush.bf16.msra.mxu3 %v1147_v55  ;;  %p1246_p3 = pnand %p1245_p2, %p1241_p13 }
  0x2c   : > { %495 = vmatpush.bf16.msra.mxu0 %v1126_v25 }
  0x2d   : > { %772 = vmatpush.bf16.msrb.mxu1 %v1158_v48  ;;  %747 = vmatpush.bf16.msra.mxu2 %v1139_v56 }
  0x2f   : > { %762 = vmatpush.bf16.msra.mxu3 %v1146_v58 }
  0x30   : > { %496 = vmatpush.bf16.msra.mxu0 %v1125_v26 }
  0x31   : > { %773 = vmatpush.bf16.msrb.mxu1 %v1157_v51  ;;  %748 = vmatpush.bf16.msra.mxu2 %v1138_v60 }
  0x33   : > { %763 = vmatpush.bf16.msra.mxu3 %v1145_v62 }
  0x34   : > { %840 = vmatpush.bf16.msrb.mxu0 %v1164_v59 }
  0x35   : > { %774 = vmatpush.bf16.msrb.mxu1 %v1156_v54  ;;  %749 = vmatpush.bf16.msra.mxu2 %v1137_v0 }
  0x38   : > { %841 = vmatpush.bf16.msrb.mxu0 %v1163_v63 }
  0x39   : > { %775 = vmatpush.bf16.msrb.mxu1 %v1155_v57 }
  0x3c   : > { %842 = vmatpush.bf16.msrb.mxu0 %v1162_v2 }
  0x3d   : > { %776 = vmatpush.bf16.msrb.mxu1 %v1154_v61 }
  0x40   : > { %843 = vmatpush.bf16.msrb.mxu0 %v1161_v3 }
  0x41   : > { %777 = vmatpush.bf16.msrb.mxu1 %v1153_v1 }
  0x8d   : > { %v1215_v39 = vpop.permute.xlu0 %1214 }
  0x8e   : > { %v1217_v42 = vunpack.i.h.bf16 %v1215_v39  ;;  %v1216_v43 = vunpack.i.l.bf16 %v1215_v39 }
  0x90   : > { %v386_v44 = vsel %vm385_vm2, %v364_v41, %v1216_v43  ;;  %v387_v45 = vsel %vm385_vm2, %v358_v40, %v1217_v42 }
  0x91   : > { %v388_v46 = vpack.c.bf16 %v387_v45, %v386_v44 }
  0x93   : > { %497 = vmatmul.bf16.vlgmr.msra.gmra.mxu0 %v388_v46 }
  0xa1   : > { %v512_v6 = vpop.f32.mrf.mxu1 }
  0xa3   : > { %1118 = vmatmul.msk.bf16.vlgmr.msrb.gmra.mxu0 %vm385_vm2, %v1124_v5 }
  0xa9   : > { %v514_v14 = vpop.f32.mrf.mxu1 }
 0x110   : > { %v498_v8 = vpop.f32.mrf.mxu0 }
 0x111   : > { %v513_v9 = vadd.f32 %v512_v6, %v498_v8 }
 0x113   : > { %v521_v11 = vmul.f32 %v1218_v7, %v513_v9 }
 0x115   : > { %v527_v12 = vadd.f32 %v1219_v10, %v521_v11 }
 0x117   : > { %v531_v17 = vmul.f32 0.2, %v527_v12  ;;  %vm529_vm5 = vcmp.gt.f32.partialorder %v527_v12, 0.0 }
 0x118   : > { %v500_v15 = vpop.f32.mrf.mxu0 }
 0x119   : > { %v515_v16 = vadd.f32 %v514_v14, %v500_v15  ;;  %v533_v20 = vsel %vm529_vm5, %v527_v12, %v531_v17 }
 0x11a   : > { %v535_v23 = vrot.slane %v533_v20, 7  ;;  %v541_v25 = vrot.slane %v533_v20, 1 }
 0x11b   : > { %v522_v18 = vmul.f32 %v1218_v7, %v515_v16 }
 0x11d   : > { %v528_v19 = vadd.f32 %v1219_v10, %v522_v18 }
 0x11f   : > { %vm530_vm6 = vcmp.gt.f32.partialorder %v528_v19, 0.0  ;;  %v532_v21 = vmul.f32 0.2, %v528_v19 }
 0x120   : > { %v845_v40 = vpop.f32.mrf.mxu0 }
 0x121   : > { %v534_v22 = vsel %vm530_vm6, %v528_v19, %v532_v21 }
 0x122   : > { %v536_v24 = vrot.slane %v534_v22, 7  ;;  %v542_v26 = vrot.slane %v534_v22, 1  ;;  %v548_v27 = vpack.c.bf16 %v534_v22, %v533_v20 }
 0x124   : > { %764 = vmatmul.bf16.vlgmr.msra.gmra.mxu3 %v548_v27  ;;  %v537_v28 = vsel %vm357_vm3, %v535_v23, %v536_v24  ;;  %v538_v29 = vsel %vm357_vm3, %v536_v24, %v535_v23  ;;  %v543_v30 = vsel %vm368_vm0, %v541_v25, %v542_v26  ;;  %v544_v31 = vsel %vm368_vm0, %v542_v26, %v541_v25 }
 0x125   : > { %v1093_v32 = vpack.c.bf16 %v537_v28, %v538_v29  ;;  %v1096_v33 = vpack.c.bf16 %v544_v31, %v543_v30 }
 0x127   : > { %1094 = vmatmul.msk.bf16.vlgmr.msra.gmra.mxu2 %vm1092_vm8, %v1093_v32  ;;  %1097 = vmatmul.msk.bf16.vlgmr.msrb.gmra.mxu1 %vm1095_vm9, %v1096_v33 }
 0x128   : > { %v847_v50 = vpop.f32.mrf.mxu0 }
 0x1a4   : > { %v779_v35 = vpop.f32.mrf.mxu1 }
 0x1a7   : > { %v765_v34 = vpop.f32.mrf.mxu3 }
 0x1aa   : > { %v751_v36 = vpop.f32.mrf.mxu2 }
 0x1ab   : > { %v766_v37 = vadd.f32 %v765_v34, %v751_v36 }
 0x1ac   : > { %v781_v45 = vpop.f32.mrf.mxu1 }
 0x1ad   : > { %v780_v39 = vadd.f32 %v779_v35, %v766_v37 }
 0x1af   : > { %v788_v4 = vmul.f32 %v1220_v38, %v780_v39  ;;  %v767_v41 = vpop.f32.mrf.mxu3 }
 0x1b1   : > { %v794_v43 = vadd.f32 %v1221_v13, %v788_v4 }
 0x1b2   : > { %v753_v42 = vpop.f32.mrf.mxu2 }
 0x1b3   : > { %v768_v44 = vadd.f32 %v767_v41, %v753_v42  ;;  %v850_v47 = vadd.f32 %v845_v40, %v794_v43 }
 0x1b5   : > { %v782_v46 = vadd.f32 %v781_v45, %v768_v44  ;;  %v854_v51 = vmul.f32 0.2, %v850_v47  ;;  %vm852_vm10 = vcmp.gt.f32.partialorder %v850_v47, 0.0 }
 0x1b7   : > { %v789_v48 = vmul.f32 %v1220_v38, %v782_v46  ;;  %v856_v54 = vsel %vm852_vm10, %v850_v47, %v854_v51 }
 0x1b9   : > { %v795_v49 = vadd.f32 %v1221_v13, %v789_v48 }
 0x1bb   : > { %v851_v52 = vadd.f32 %v847_v50, %v795_v49 }
 0x1bd   : > { %vm853_vm11 = vcmp.gt.f32.partialorder %v851_v52, 0.0  ;;  %v855_v53 = vmul.f32 0.2, %v851_v52 }
 0x1bf   : > { %v857_v55 = vsel %vm853_vm11, %v851_v52, %v855_v53 }
 0x1c0   : > { %v1169_v56 = vpack.c.bf16 %v857_v55, %v856_v54 }
 0x1c2   : > { %1170 = vst [vmem:[%s299_s26] sm:$0xff] %v1169_v56  }
 0x1c3   : > { %1249 = shalt.err (!%p1246_p3)
}
 0x1c4   : > { %s1288_s20 = smov 4  }
 0x1c5   : > { %1171 = dma.vmem_to_hbm [thread:$0]  (%p1372_p5), %s876_s10, 128, %s878_s13, %s863_s9, %s1286_s25, %s1286_s25, %s1288_s20  }
 0x1c6 PF: > { %p1177_p4 = scmp.ge.s32.totalorder %s1284_s30, 2  ;;  %s892_s24 = sand.u32 1, %s1272_s27  }
 0x1c7   : > { %s893_s26 = scalar_lea.sflag [#allocation3], %s892_s24 }
 0x1c8   : > { %p1174_p7 = pnand %p1177_p4, %p1376_p6 }
 0x1ca   : > { %p1175_p8 = pneg %p1174_p7 }
 0x1cc   : > { %1267 = dma.done.wait (%p1175_p8), %s893_s26, 128  }
 0x1cd   : > { %1269 = vsyncadd (%p1175_p8), %s893_s26, 4294967168  ;;  %p18_p9 = scmp.ge.s32.totalorder %s1359_s11, 4   ;;  %s1611_s27 = smov %s1276_s28 }
 0x1ce   : > { %s1612_s28 = smov %s1280_s29  ;;  %s1613_s29 = smov %s1370_s14 }
 0x1cf   : > { %s1614_s30 = smov %s1359_s11  ;;  %20 = sbr.rel (!%p18_p9) target bundleno = 3 (0x3), region = 87 }
 0x1d4   :  { %899 = vsyncpa [#allocation3], 1 }
 0x1d5   :  { %901 = vsyncpa [#allocation3 + $0x1], 1 }

</bundles_post_ra>
